<compile_context>
chip_gen: v7x
topology: tpu7x:2x2x1
jax: 0.10.0
libtpu: 0.0.40
codegen_flags: <defaults>
</compile_context>

<pallas_src>
import functools
import math

import jax
import jax.numpy as jnp
from jax.experimental import pallas as pl
from jax.experimental.pallas import tpu as pltpu

PAD_TOKEN_IDX = 0   # BytePairEncoding.PAD_token_idx
SEP_TOKEN_IDX = 3   # BytePairEncoding.SEP_token_idx

LANE = 128
NEG_INF = -1e30
LN_EPS = 1e-5


def _round_up(x, m):
    return ((x + m - 1) // m) * m


# --------------------------------------------------------------------------- #
# Fused all-layers encoder kernel: grid = (batch_blocks, num_layers)
# --------------------------------------------------------------------------- #
def make_encoder_kernel(n_head: int, h_real: int, ff_real: int,
                        h_pad: int, ff_pad: int):
    inv_h = 1.0 / float(h_real)
    dk_p = h_pad // n_head

    def layer_norm(x, gamma, beta):
        # x / gamma / beta are zero on padded lanes, so sums over the padded lane
        # dim equal sums over the real h_real dims; padded output lanes stay 0.
        mu = jnp.sum(x, axis=-1, keepdims=True) * inv_h
        var = jnp.sum(x * x, axis=-1, keepdims=True) * inv_h - mu * mu
        var = jnp.maximum(var, 0.0)
        return (x - mu) * jax.lax.rsqrt(var + LN_EPS) * gamma + beta

    def kernel(x_ref, keyb_ref, keep_ref,
               wqkv_ref, wo_ref, w1_ref, w2_ref, misc_ref,
               out_ref):
        l = pl.program_id(1)
        Bb, S, Hp = out_ref.shape
        R = Bb * S

        # Layer 0: seed the activation carry.  out_ref's block index is constant in
        # l, so it stays VMEM-resident across the whole layer axis (accumulator).
        @pl.when(l == 0)
        def _():
            out_ref[...] = x_ref[...]

        x2 = out_ref[...].reshape(R, Hp)                 # (R, Hp) f32, padded lanes == 0
        keep2 = keep_ref[...].reshape(R, 1)              # 1.0 = real token, 0.0 = <PAD>
        key_bias = keyb_ref[...].reshape(Bb, 1, 1, S)    # -1e30 at <PAD> keys, else 0

        # ---- fused QKV: one MXU pass, M = Bb*S, unpadded contraction dim --------
        qkv = jnp.dot(x2[:, :h_real].astype(jnp.bfloat16), wqkv_ref[0],
                      preferred_element_type=jnp.float32)          # (R, 3*Hp)
        qkvb = qkv.astype(jnp.bfloat16)                  # single cast before head split

        def to_heads(t):          # (R, Hp) bf16 -> (Bb*n_head, S, dk_p)
            t = jnp.swapaxes(t.reshape(Bb, S, n_head, dk_p), 1, 2)
            return t.reshape(Bb * n_head, S, dk_p)

        q = to_heads(qkvb[:, :Hp])          # 1/sqrt(d_k) already folded into Wq
        k = to_heads(qkvb[:, Hp:2 * Hp])
        v = to_heads(qkvb[:, 2 * Hp:])

        # ---- attention: all (batch, head) pairs in one batched contraction ------
        s = jnp.einsum('gqd,gkd->gqk', q, k,
                       preferred_element_type=jnp.float32)          # (Bb*h, S, S)
        s = s.reshape(Bb, n_head, S, S) + key_bias
        m = jnp.max(s, axis=-1, keepdims=True)
        p = jnp.exp(s - m)
        p = p * pl.reciprocal(jnp.sum(p, axis=-1, keepdims=True), approx=True)
        p = p.reshape(Bb * n_head, S, S).astype(jnp.bfloat16)
        attn = jnp.einsum('gqk,gkd->gqd', p, v,
                          preferred_element_type=jnp.float32)       # (Bb*h, S, dk_p)
        attn = attn.reshape(Bb, n_head, S, dk_p).astype(jnp.bfloat16)

        # ---- output projection, head-merge folded into Wo -----------------------
        # Per-head matmul accumulation: no (h, S, d) -> (S, h*d) XLU relayout.
        # (Zeroing <PAD> rows commutes with Wo; it is applied once at layer output.)
        wo = wo_ref[0]                                   # (n_head, dk_p, Hp) bf16
        o2 = jnp.zeros((R, Hp), jnp.float32)
        for h in range(n_head):
            o2 = o2 + jnp.dot(attn[:, h].reshape(R, dk_p), wo[h],
                              preferred_element_type=jnp.float32)

        # ---- residual + norm1, feed-forward, residual + norm2 -------------------
        misc = misc_ref[0]                               # (8, W): b1,b2,g1,be1,g2,be2
        h1 = layer_norm(o2 + x2, misc[2:3, :Hp], misc[3:4, :Hp])

        ff = jnp.dot(h1[:, :h_real].astype(jnp.bfloat16), w1_ref[0],
                     preferred_element_type=jnp.float32) + misc[0:1, :ff_pad]
        ff = jnp.maximum(ff, 0.0)
        ff2 = jnp.dot(ff[:, :ff_real].astype(jnp.bfloat16), w2_ref[0],
                      preferred_element_type=jnp.float32) + misc[1:2, :Hp]

        h2 = layer_norm(ff2 + h1, misc[4:5, :Hp], misc[5:6, :Hp]) * keep2
        out_ref[...] = h2.reshape(Bb, S, Hp)             # carry to next layer

    return kernel


def encoder_stack(x_pad, key_bias, keep, stacked, *, n_head, h_real, ff_real,
                  batch_blocks=1):
    """Run all encoder layers in a single pallas_call."""
    B, S, Hp = x_pad.shape
    L = stacked['wqkv'].shape[0]
    FFp = stacked['w1'].shape[-1]
    W = stacked['misc'].shape[-1]
    dk_p = Hp // n_head
    assert B % batch_blocks == 0
    Bb = B // batch_blocks
    R = Bb * S

    kernel = make_encoder_kernel(n_head, h_real, ff_real, Hp, FFp)

    bmap = lambda bb, l: (bb, 0, 0)       # per-batch-block data, resident across layers
    lmap = lambda bb, l: (l, 0, 0)        # per-layer stacked weights
    lmap4 = lambda bb, l: (l, 0, 0, 0)

    flops = 2 * batch_blocks * L * (
        R * h_real * 3 * Hp                      # fused QKV
        + 2 * Bb * n_head * S * S * dk_p         # scores + PV
        + R * n_head * dk_p * Hp                 # output projection
        + R * h_real * FFp + R * ff_real * Hp)   # FFN
    trans = batch_blocks * L * (Bb * n_head * S * S + Bb * n_head * S + 2 * R)
    weight_bytes = sum(int(v.size) * v.dtype.itemsize for v in stacked.values())
    bytes_accessed = weight_bytes + 2 * 4 * B * S * Hp + 8 * B * S

    grid_spec = pltpu.PrefetchScalarGridSpec(
        num_scalar_prefetch=0,
        grid=(batch_blocks, L),
        in_specs=[
            pl.BlockSpec((Bb, S, Hp), bmap),             # x (padded, f32)
            pl.BlockSpec((Bb, 1, S), bmap),              # key bias
            pl.BlockSpec((Bb, S, 1), bmap),              # keep mask
            pl.BlockSpec((1, h_real, 3 * Hp), lmap),     # fused Wqkv (bf16, unpadded K)
            pl.BlockSpec((1, n_head, dk_p, Hp), lmap4),  # Wo, head-merge folded (bf16)
            pl.BlockSpec((1, h_real, FFp), lmap),        # W1 (bf16, unpadded K)
            pl.BlockSpec((1, ff_real, Hp), lmap),        # W2 (bf16, unpadded K)
            pl.BlockSpec((1, 8, W), lmap),               # b1,b2 + layer-norm params (f32)
        ],
        out_specs=pl.BlockSpec((Bb, S, Hp), bmap),
    )

    return pl.pallas_call(
        kernel,
        out_shape=jax.ShapeDtypeStruct((B, S, Hp), jnp.float32),
        grid_spec=grid_spec,
        compiler_params=pltpu.CompilerParams(
            dimension_semantics=("parallel", "arbitrary")),
        cost_estimate=pl.CostEstimate(flops=int(flops),
                                      transcendentals=int(trans),
                                      bytes_accessed=int(bytes_accessed)),
    )(x_pad, key_bias, keep,
      stacked['wqkv'], stacked['wo'], stacked['w1'], stacked['w2'],
      stacked['misc'])


# --------------------------------------------------------------------------- #
# Parameter packing: stack layers, lane-pad outputs only, fold scale, cast bf16
# --------------------------------------------------------------------------- #
def pack_params(params, *, n_head, h_pad, ff_pad):
    layers = params['layers']
    H = params['tok_emb'].shape[1]
    FF = layers[0]['w1'].shape[1]
    dk = H // n_head
    dk_p = h_pad // n_head
    scale = 1.0 / math.sqrt(dk)
    W = max(h_pad, ff_pad)

    def pad_cols(w, c):
        return jnp.pad(w, ((0, 0), (0, c - w.shape[1])))

    def pad_head_cols(w):           # (H, n_head*dk) -> (H, n_head*dk_p), K unpadded
        w = w.reshape(H, n_head, dk)
        w = jnp.pad(w, ((0, 0), (0, 0), (0, dk_p - dk)))
        return w.reshape(H, n_head * dk_p)

    def pack_wo(w):                 # (n_head*dk, H) -> (n_head, dk_p, h_pad)
        w = w.reshape(n_head, dk, H)
        return jnp.pad(w, ((0, 0), (0, dk_p - dk), (0, h_pad - H)))

    wqkv, wo, w1, w2, misc = [], [], [], [], []
    for lp in layers:
        wqkv.append(jnp.concatenate(
            [pad_head_cols(lp['wq'] * scale),       # fold 1/sqrt(d_k) into Wq
             pad_head_cols(lp['wk']),
             pad_head_cols(lp['wv'])], axis=-1))    # (H, 3*h_pad)
        wo.append(pack_wo(lp['wo']))
        w1.append(pad_cols(lp['w1'], ff_pad))       # (H, ff_pad)
        w2.append(pad_cols(lp['w2'], h_pad))        # (FF, h_pad)
        # gamma padded with ZEROS (not ones) so padded LN output lanes stay 0.
        misc.append(jnp.concatenate(
            [pad_cols(lp['b1'], W), pad_cols(lp['b2'], W),
             pad_cols(lp['g1'], W), pad_cols(lp['beta1'], W),
             pad_cols(lp['g2'], W), pad_cols(lp['beta2'], W),
             jnp.zeros((2, W), jnp.float32)], axis=0))            # (8, W)

    stack = lambda xs, dt: jnp.stack(xs).astype(dt)
    return dict(wqkv=stack(wqkv, jnp.bfloat16),
                wo=stack(wo, jnp.bfloat16),
                w1=stack(w1, jnp.bfloat16),
                w2=stack(w2, jnp.bfloat16),
                misc=stack(misc, jnp.float32))


# --------------------------------------------------------------------------- #
# Embeddings / init (plain JAX glue)
# --------------------------------------------------------------------------- #
def make_positional_encoding(hidden_dim, max_len):
    pe = jnp.zeros((max_len, hidden_dim), jnp.float32)
    position = jnp.arange(max_len, dtype=jnp.float32)[:, None]
    div_term = jnp.exp(jnp.arange(0, hidden_dim, 2, dtype=jnp.float32) *
                       (-math.log(10000.0) / hidden_dim))
    pe = pe.at[:, 0::2].set(jnp.sin(position * div_term))
    pe = pe.at[:, 1::2].set(jnp.cos(position * div_term))
    return pe[:, None, :]   # (max_len, 1, hidden)


def init_params(key, token_num, hidden_dim, num_layers, feed_forward_dim):
    keys = jax.random.split(key, 2 + num_layers)
    tok_emb = 0.02 * jax.random.normal(keys[0], (token_num, hidden_dim), jnp.float32)
    tok_emb = tok_emb.at[PAD_TOKEN_IDX].set(0.0)     # nn.Embedding padding_idx row
    seg_emb = 0.02 * jax.random.normal(keys[1], (3, hidden_dim), jnp.float32)

    def lin(k, fan_in, fan_out):   # stored as (in, out), i.e. PyTorch weight.T
        return jax.random.normal(k, (fan_in, fan_out), jnp.float32) / math.sqrt(fan_in)

    layers = []
    for li in range(num_layers):
        lk = jax.random.split(keys[2 + li], 12)
        layers.append(dict(
            wq=lin(lk[0], hidden_dim, hidden_dim),
            wk=lin(lk[1], hidden_dim, hidden_dim),
            wv=lin(lk[2], hidden_dim, hidden_dim),
            wo=lin(lk[3], hidden_dim, hidden_dim),
            w1=lin(lk[4], hidden_dim, feed_forward_dim),
            b1=0.01 * jax.random.normal(lk[5], (1, feed_forward_dim), jnp.float32),
            w2=lin(lk[6], feed_forward_dim, hidden_dim),
            b2=0.01 * jax.random.normal(lk[7], (1, hidden_dim), jnp.float32),
            g1=1.0 + 0.01 * jax.random.normal(lk[8], (1, hidden_dim), jnp.float32),
            beta1=0.01 * jax.random.normal(lk[9], (1, hidden_dim), jnp.float32),
            g2=1.0 + 0.01 * jax.random.normal(lk[10], (1, hidden_dim), jnp.float32),
            beta2=0.01 * jax.random.normal(lk[11], (1, hidden_dim), jnp.float32),
        ))
    return dict(tok_emb=tok_emb, seg_emb=seg_emb, layers=layers)


def _embed(tokens_sb, params, pe):
    """Token + positional + segmentation embeddings, <PAD> rows zeroed."""
    S, _ = tokens_sb.shape
    padding_mask = tokens_sb == PAD_TOKEN_IDX
    out = params['tok_emb'][tokens_sb] + pe[:S]
    is_sep = (tokens_sb == SEP_TOKEN_IDX).astype(jnp.int32)
    seg_ids = jnp.clip(jnp.cumsum(is_sep, axis=0) - is_sep,
                       0, params['seg_emb'].shape[0] - 1)
    out = out + params['seg_emb'][seg_ids]
    out = out * (~padding_mask)[:, :, None].astype(out.dtype)
    return out, padding_mask


def base_model_forward(tokens_sb, params, pe, *, n_head, batch_blocks=1):
    """tokens_sb: (seq_len, batch) int32 token ids. Returns (seq_len, batch, hidden)."""
    S, B = tokens_sb.shape
    H = params['tok_emb'].shape[1]
    FF = params['layers'][0]['w1'].shape[1]
    H_pad = _round_up(H, LANE)
    FF_pad = _round_up(FF, LANE)
    assert H % n_head == 0 and H_pad % n_head == 0

    out, padding_mask = _embed(tokens_sb, params, pe)             # (S, B, H)

    x_bsh = jnp.transpose(out, (1, 0, 2)).astype(jnp.float32)     # (B, S, H)
    x_pad = jnp.pad(x_bsh, ((0, 0), (0, 0), (0, H_pad - H)))      # lane-pad hidden

    mask_bs = padding_mask.T                                      # (B, S) bool
    key_bias = jnp.where(mask_bs, NEG_INF, 0.0).astype(jnp.float32)[:, None, :]
    keep = (~mask_bs).astype(jnp.float32)[:, :, None]             # (B, S, 1)

    stacked = pack_params(params, n_head=n_head, h_pad=H_pad, ff_pad=FF_pad)
    out_pad = encoder_stack(x_pad, key_bias, keep, stacked,
                            n_head=n_head, h_real=H, ff_real=FF,
                            batch_blocks=batch_blocks)            # (B, S, H_pad)
    return jnp.transpose(out_pad[..., :H], (1, 0, 2))             # (S, B, H)


# --------------------------------------------------------------------------- #
# Pure-JAX f32 reference (mirrors the PyTorch module) for a correctness check
# --------------------------------------------------------------------------- #
def reference_forward(tokens_sb, params, pe, *, n_head):
    S, B = tokens_sb.shape
    H = params['tok_emb'].shape[1]
    dk = H // n_head

    out, padding_mask = _embed(tokens_sb, params, pe)
    x = jnp.transpose(out, (1, 0, 2)).astype(jnp.float32)         # (B, S, H)
    mask = padding_mask.T                                         # (B, S)
    keep = (~mask).astype(jnp.float32)[:, :, None]

    def ln(v, g, b):
        mu = jnp.mean(v, axis=-1, keepdims=True)
        var = jnp.mean((v - mu) ** 2, axis=-1, keepdims=True)
        return (v - mu) * jax.lax.rsqrt(var + LN_EPS) * g + b

    for lp in params['layers']:
        q = (x @ lp['wq']).reshape(B, S, n_head, dk)
        k = (x @ lp['wk']).reshape(B, S, n_head, dk)
        v = (x @ lp['wv']).reshape(B, S, n_head, dk)
        s = jnp.einsum('bqhd,bkhd->bhqk', q, k) / math.sqrt(dk)
        s = jnp.where(mask[:, None, None, :], NEG_INF, s)
        p = jax.nn.softmax(s, axis=-1)
        a = jnp.einsum('bhqk,bkhd->bqhd', p, v).reshape(B, S, H) * keep
        a = a @ lp['wo']
        h1 = ln(a + x, lp['g1'], lp['beta1'])
        ff = jnp.maximum(h1 @ lp['w1'] + lp['b1'], 0.0) @ lp['w2'] + lp['b2']
        x = ln(ff + h1, lp['g2'], lp['beta2']) * keep
    return jnp.transpose(x, (1, 0, 2))


if __name__ == "__main__":
    SEQ, BATCH = 8, 2
    HIDDEN, N_HEAD, FF_DIM, NUM_LAYERS = 32, 4, 64, 2
    TOKEN_NUM, MAX_LEN = 50, 64

    key = jax.random.PRNGKey(0)
    k_tok, k_par = jax.random.split(key)

    tokens = jax.random.randint(k_tok, (SEQ, BATCH), 4, TOKEN_NUM, dtype=jnp.int32)
    tokens = tokens.at[4, :].set(SEP_TOKEN_IDX)        # one SEP per sequence
    tokens = tokens.at[6:, 1].set(PAD_TOKEN_IDX)       # pad tail of sequence 1

    params = init_params(k_par, TOKEN_NUM, HIDDEN, NUM_LAYERS, FF_DIM)
    pe = make_positional_encoding(HIDDEN, MAX_LEN)

    fwd = jax.jit(functools.partial(base_model_forward, n_head=N_HEAD))
    out = jax.block_until_ready(fwd(tokens, params, pe))

    assert out.shape == (SEQ, BATCH, HIDDEN)
    assert bool(jnp.all(jnp.isfinite(out)))

    # Compare against the full-f32 JAX reference (tolerance accounts for bf16
    # MXU inputs and the approximate-reciprocal softmax normalization).
    ref = reference_forward(tokens, params, pe, n_head=N_HEAD)
    err = float(jnp.max(jnp.abs(out - ref)))
    assert err < 0.25, f"max abs error vs reference too large: {err}"

    print("KERNEL_OK")
</pallas_src>

<mosaic_0001>
module attributes {stable_mosaic.version = 11 : i64} {
  func.func @kernel(%arg0: i32, %arg1: i32, %arg2: memref<2x8x128xf32, #tpu.memory_space<vmem>>, %arg3: memref<2x1x8xf32, #tpu.memory_space<vmem>>, %arg4: memref<2x8x1xf32, #tpu.memory_space<vmem>>, %arg5: memref<1x32x384xbf16, #tpu.memory_space<vmem>>, %arg6: memref<1x4x32x128xbf16, #tpu.memory_space<vmem>>, %arg7: memref<1x32x128xbf16, #tpu.memory_space<vmem>>, %arg8: memref<1x64x128xbf16, #tpu.memory_space<vmem>>, %arg9: memref<1x8x128xf32, #tpu.memory_space<vmem>>, %arg10: memref<2x8x128xf32, #tpu.memory_space<vmem>>) attributes {dimension_semantics = [#tpu.dimension_semantics<parallel>, #tpu.dimension_semantics<arbitrary>], iteration_bounds = array<i64: 1, 2>, scalar_prefetch = 0 : i64, scratch_operands = 0 : i64, tpu.core_type = #tpu.core_type<tc>, window_params = [{transform_indices = @transform_0, window_bounds = array<i64: 2, 8, 128>}, {transform_indices = @transform_1, window_bounds = array<i64: 2, 1, 8>}, {transform_indices = @transform_2, window_bounds = array<i64: 2, 8, 1>}, {transform_indices = @transform_3, window_bounds = array<i64: 1, 32, 384>}, {transform_indices = @transform_4, window_bounds = array<i64: 1, 4, 32, 128>}, {transform_indices = @transform_5, window_bounds = array<i64: 1, 32, 128>}, {transform_indices = @transform_6, window_bounds = array<i64: 1, 64, 128>}, {transform_indices = @transform_7, window_bounds = array<i64: 1, 8, 128>}, {transform_indices = @transform_8, window_bounds = array<i64: 2, 8, 128>}]} {
    %c0_i32 = arith.constant 0 : i32
    %0 = arith.cmpi eq, %arg1, %c0_i32 : i32
    %1 = arith.extui %0 : i1 to i32
    %c0_i32_0 = arith.constant 0 : i32
    %2 = arith.cmpi ne, %1, %c0_i32_0 : i32
    scf.if %2 {
      %c0_52 = arith.constant 0 : index
      %c0_53 = arith.constant 0 : index
      %c0_54 = arith.constant 0 : index
      %155 = vector.load %arg2[%c0_52, %c0_53, %c0_54] : memref<2x8x128xf32, #tpu.memory_space<vmem>>, vector<2x8x128xf32>
      %c0_55 = arith.constant 0 : index
      %c0_56 = arith.constant 0 : index
      %c0_57 = arith.constant 0 : index
      %156 = vector.load %arg10[%c0_55, %c0_56, %c0_57] : memref<2x8x128xf32, #tpu.memory_space<vmem>>, vector<2x8x128xf32>
      tpu.vector_store %arg10[%c0_55, %c0_56, %c0_57], %155 {strides = array<i32>} : memref<2x8x128xf32, #tpu.memory_space<vmem>>, vector<2x8x128xf32>,
    } else {
    }
    %c0 = arith.constant 0 : index
    %c0_1 = arith.constant 0 : index
    %c0_2 = arith.constant 0 : index
    %3 = vector.load %arg10[%c0, %c0_1, %c0_2] : memref<2x8x128xf32, #tpu.memory_space<vmem>>, vector<2x8x128xf32>
    %4 = vector.shape_cast %3 : vector<2x8x128xf32> to vector<16x128xf32>
    %c0_3 = arith.constant 0 : index
    %c0_4 = arith.constant 0 : index
    %c0_5 = arith.constant 0 : index
    %5 = vector.load %arg4[%c0_3, %c0_4, %c0_5] : memref<2x8x1xf32, #tpu.memory_space<vmem>>, vector<2x8x1xf32>
    %6 = vector.shape_cast %5 : vector<2x8x1xf32> to vector<16x1xf32>
    %c0_6 = arith.constant 0 : index
    %c0_7 = arith.constant 0 : index
    %c0_8 = arith.constant 0 : index
    %7 = vector.load %arg3[%c0_6, %c0_7, %c0_8] : memref<2x1x8xf32, #tpu.memory_space<vmem>>, vector<2x1x8xf32>
    %8 = vector.shape_cast %7 : vector<2x1x8xf32> to vector<2x1x1x8xf32>
    %9 = vector.extract_strided_slice %4 {offsets = [0, 0], sizes = [16, 32], strides = [1, 1]} : vector<16x128xf32> to vector<16x32xf32>
    %10 = arith.truncf %9 : vector<16x32xf32> to vector<16x32xbf16>
    %c0_9 = arith.constant 0 : index
    %c0_10 = arith.constant 0 : index
    %c0_11 = arith.constant 0 : index
    %11 = vector.load %arg5[%c0_9, %c0_10, %c0_11] : memref<1x32x384xbf16, #tpu.memory_space<vmem>>, vector<1x32x384xbf16>
    %12 = vector.shape_cast %11 : vector<1x32x384xbf16> to vector<32x384xbf16>
    %cst = arith.constant dense<0.000000e+00> : vector<16x384xf32>
    %13 = tpu.matmul %10, %12, %cst {dimension_numbers = #tpu.dot_dimension_numbers<[1], [0], [0], [1], [0, 0, 1, 1], [], []>} : vector<16x32xbf16>, vector<32x384xbf16>, vector<16x384xf32> -> vector<16x384xf32>
    %14 = arith.truncf %13 : vector<16x384xf32> to vector<16x384xbf16>
    %15 = vector.extract_strided_slice %14 {offsets = [0, 0], sizes = [16, 128], strides = [1, 1]} : vector<16x384xbf16> to vector<16x128xbf16>
    %16 = vector.shape_cast %15 : vector<16x128xbf16> to vector<2x8x4x32xbf16>
    %17 = tpu.transpose %16, [0, 2, 1, 3] : vector<2x8x4x32xbf16> -> vector<2x4x8x32xbf16>
    %18 = vector.shape_cast %17 : vector<2x4x8x32xbf16> to vector<8x8x32xbf16>
    %19 = vector.extract_strided_slice %14 {offsets = [0, 128], sizes = [16, 128], strides = [1, 1]} : vector<16x384xbf16> to vector<16x128xbf16>
    %20 = vector.shape_cast %19 : vector<16x128xbf16> to vector<2x8x4x32xbf16>
    %21 = tpu.transpose %20, [0, 2, 1, 3] : vector<2x8x4x32xbf16> -> vector<2x4x8x32xbf16>
    %22 = vector.shape_cast %21 : vector<2x4x8x32xbf16> to vector<8x8x32xbf16>
    %23 = vector.extract_strided_slice %14 {offsets = [0, 256], sizes = [16, 128], strides = [1, 1]} : vector<16x384xbf16> to vector<16x128xbf16>
    %24 = vector.shape_cast %23 : vector<16x128xbf16> to vector<2x8x4x32xbf16>
    %25 = tpu.transpose %24, [0, 2, 1, 3] : vector<2x8x4x32xbf16> -> vector<2x4x8x32xbf16>
    %26 = vector.shape_cast %25 : vector<2x4x8x32xbf16> to vector<8x8x32xbf16>
    "tpu.trace_start"() <{level = 10 : i32, message = "gqd,gkd->gqk"}> : () -> ()
    %cst_12 = arith.constant dense<0.000000e+00> : vector<8x8x8xf32>
    %27 = tpu.matmul %18, %22, %cst_12 {dimension_numbers = #tpu.dot_dimension_numbers<[2], [2], [1], [1], [0, 0, 0, 1, 1, 1], [0], [0]>} : vector<8x8x32xbf16>, vector<8x8x32xbf16>, vector<8x8x8xf32> -> vector<8x8x8xf32>
    "tpu.trace_stop"() : () -> ()
    %28 = vector.shape_cast %27 : vector<8x8x8xf32> to vector<2x4x8x8xf32>
    %29 = vector.broadcast %8 : vector<2x1x1x8xf32> to vector<2x4x8x8xf32>
    %30 = arith.addf %28, %29 : vector<2x4x8x8xf32>
    %cst_13 = arith.constant dense<0xFF800000> : vector<2x4x8xf32>
    %31 = vector.multi_reduction <maximumf>, %30, %cst_13 [3] : vector<2x4x8x8xf32> to vector<2x4x8xf32>
    %32 = vector.shape_cast %31 : vector<2x4x8xf32> to vector<2x4x8x1xf32>
    %33 = vector.broadcast %32 : vector<2x4x8x1xf32> to vector<2x4x8x8xf32>
    %34 = arith.subf %30, %33 : vector<2x4x8x8xf32>
    %35 = math.exp %34 : vector<2x4x8x8xf32>
    %cst_14 = arith.constant dense<0.000000e+00> : vector<2x4x8xf32>
    %36 = vector.multi_reduction <add>, %35, %cst_14 [3] : vector<2x4x8x8xf32> to vector<2x4x8xf32>
    %37 = vector.shape_cast %36 : vector<2x4x8xf32> to vector<2x4x8x1xf32>
    %38 = tpu.reciprocal %37 {approx = true} : vector<2x4x8x1xf32> -> vector<2x4x8x1xf32>
    %39 = vector.broadcast %38 : vector<2x4x8x1xf32> to vector<2x4x8x8xf32>
    %40 = arith.mulf %35, %39 : vector<2x4x8x8xf32>
    %41 = vector.shape_cast %40 : vector<2x4x8x8xf32> to vector<8x8x8xf32>
    %42 = arith.truncf %41 : vector<8x8x8xf32> to vector<8x8x8xbf16>
    "tpu.trace_start"() <{level = 10 : i32, message = "gqk,gkd->gqd"}> : () -> ()
    %cst_15 = arith.constant dense<0.000000e+00> : vector<8x8x32xf32>
    %43 = tpu.matmul %42, %26, %cst_15 {dimension_numbers = #tpu.dot_dimension_numbers<[2], [1], [1], [2], [0, 0, 0, 1, 1, 2], [0], [0]>} : vector<8x8x8xbf16>, vector<8x8x32xbf16>, vector<8x8x32xf32> -> vector<8x8x32xf32>
    "tpu.trace_stop"() : () -> ()
    %44 = vector.shape_cast %43 : vector<8x8x32xf32> to vector<2x4x8x32xf32>
    %45 = arith.truncf %44 : vector<2x4x8x32xf32> to vector<2x4x8x32xbf16>
    %c0_16 = arith.constant 0 : index
    %c0_17 = arith.constant 0 : index
    %c0_18 = arith.constant 0 : index
    %c0_19 = arith.constant 0 : index
    %46 = vector.load %arg6[%c0_16, %c0_17, %c0_18, %c0_19] : memref<1x4x32x128xbf16, #tpu.memory_space<vmem>>, vector<1x4x32x128xbf16>
    %47 = vector.shape_cast %46 : vector<1x4x32x128xbf16> to vector<4x32x128xbf16>
    %cst_20 = arith.constant 0.000000e+00 : f32
    %48 = vector.broadcast %cst_20 : f32 to vector<16x128xf32>
    %49 = vector.extract_strided_slice %45 {offsets = [0, 0, 0, 0], sizes = [2, 1, 8, 32], strides = [1, 1, 1, 1]} : vector<2x4x8x32xbf16> to vector<2x1x8x32xbf16>
    %50 = vector.shape_cast %49 : vector<2x1x8x32xbf16> to vector<2x8x32xbf16>
    %51 = vector.shape_cast %50 : vector<2x8x32xbf16> to vector<16x32xbf16>
    %52 = vector.extract_strided_slice %47 {offsets = [0, 0, 0], sizes = [1, 32, 128], strides = [1, 1, 1]} : vector<4x32x128xbf16> to vector<1x32x128xbf16>
    %53 = vector.shape_cast %52 : vector<1x32x128xbf16> to vector<32x128xbf16>
    %cst_21 = arith.constant dense<0.000000e+00> : vector<16x128xf32>
    %54 = tpu.matmul %51, %53, %cst_21 {dimension_numbers = #tpu.dot_dimension_numbers<[1], [0], [0], [1], [0, 0, 1, 1], [], []>} : vector<16x32xbf16>, vector<32x128xbf16>, vector<16x128xf32> -> vector<16x128xf32>
    %55 = arith.addf %48, %54 : vector<16x128xf32>
    %56 = vector.extract_strided_slice %45 {offsets = [0, 1, 0, 0], sizes = [2, 1, 8, 32], strides = [1, 1, 1, 1]} : vector<2x4x8x32xbf16> to vector<2x1x8x32xbf16>
    %57 = vector.shape_cast %56 : vector<2x1x8x32xbf16> to vector<2x8x32xbf16>
    %58 = vector.shape_cast %57 : vector<2x8x32xbf16> to vector<16x32xbf16>
    %59 = vector.extract_strided_slice %47 {offsets = [1, 0, 0], sizes = [1, 32, 128], strides = [1, 1, 1]} : vector<4x32x128xbf16> to vector<1x32x128xbf16>
    %60 = vector.shape_cast %59 : vector<1x32x128xbf16> to vector<32x128xbf16>
    %cst_22 = arith.constant dense<0.000000e+00> : vector<16x128xf32>
    %61 = tpu.matmul %58, %60, %cst_22 {dimension_numbers = #tpu.dot_dimension_numbers<[1], [0], [0], [1], [0, 0, 1, 1], [], []>} : vector<16x32xbf16>, vector<32x128xbf16>, vector<16x128xf32> -> vector<16x128xf32>
    %62 = arith.addf %55, %61 : vector<16x128xf32>
    %63 = vector.extract_strided_slice %45 {offsets = [0, 2, 0, 0], sizes = [2, 1, 8, 32], strides = [1, 1, 1, 1]} : vector<2x4x8x32xbf16> to vector<2x1x8x32xbf16>
    %64 = vector.shape_cast %63 : vector<2x1x8x32xbf16> to vector<2x8x32xbf16>
    %65 = vector.shape_cast %64 : vector<2x8x32xbf16> to vector<16x32xbf16>
    %66 = vector.extract_strided_slice %47 {offsets = [2, 0, 0], sizes = [1, 32, 128], strides = [1, 1, 1]} : vector<4x32x128xbf16> to vector<1x32x128xbf16>
    %67 = vector.shape_cast %66 : vector<1x32x128xbf16> to vector<32x128xbf16>
    %cst_23 = arith.constant dense<0.000000e+00> : vector<16x128xf32>
    %68 = tpu.matmul %65, %67, %cst_23 {dimension_numbers = #tpu.dot_dimension_numbers<[1], [0], [0], [1], [0, 0, 1, 1], [], []>} : vector<16x32xbf16>, vector<32x128xbf16>, vector<16x128xf32> -> vector<16x128xf32>
    %69 = arith.addf %62, %68 : vector<16x128xf32>
    %70 = vector.extract_strided_slice %45 {offsets = [0, 3, 0, 0], sizes = [2, 1, 8, 32], strides = [1, 1, 1, 1]} : vector<2x4x8x32xbf16> to vector<2x1x8x32xbf16>
    %71 = vector.shape_cast %70 : vector<2x1x8x32xbf16> to vector<2x8x32xbf16>
    %72 = vector.shape_cast %71 : vector<2x8x32xbf16> to vector<16x32xbf16>
    %73 = vector.extract_strided_slice %47 {offsets = [3, 0, 0], sizes = [1, 32, 128], strides = [1, 1, 1]} : vector<4x32x128xbf16> to vector<1x32x128xbf16>
    %74 = vector.shape_cast %73 : vector<1x32x128xbf16> to vector<32x128xbf16>
    %cst_24 = arith.constant dense<0.000000e+00> : vector<16x128xf32>
    %75 = tpu.matmul %72, %74, %cst_24 {dimension_numbers = #tpu.dot_dimension_numbers<[1], [0], [0], [1], [0, 0, 1, 1], [], []>} : vector<16x32xbf16>, vector<32x128xbf16>, vector<16x128xf32> -> vector<16x128xf32>
    %76 = arith.addf %69, %75 : vector<16x128xf32>
    %c0_25 = arith.constant 0 : index
    %c0_26 = arith.constant 0 : index
    %c0_27 = arith.constant 0 : index
    %77 = vector.load %arg9[%c0_25, %c0_26, %c0_27] : memref<1x8x128xf32, #tpu.memory_space<vmem>>, vector<1x8x128xf32>
    %78 = vector.shape_cast %77 : vector<1x8x128xf32> to vector<8x128xf32>
    %79 = arith.addf %76, %4 : vector<16x128xf32>
    %80 = vector.extract_strided_slice %78 {offsets = [2, 0], sizes = [1, 128], strides = [1, 1]} : vector<8x128xf32> to vector<1x128xf32>
    %81 = vector.extract_strided_slice %78 {offsets = [3, 0], sizes = [1, 128], strides = [1, 1]} : vector<8x128xf32> to vector<1x128xf32>
    %cst_28 = arith.constant dense<0.000000e+00> : vector<16xf32>
    %82 = vector.multi_reduction <add>, %79, %cst_28 [1] : vector<16x128xf32> to vector<16xf32>
    %83 = vector.shape_cast %82 : vector<16xf32> to vector<16x1xf32>
    %cst_29 = arith.constant 3.125000e-02 : f32
    %84 = vector.broadcast %cst_29 : f32 to vector<16x1xf32>
    %85 = arith.mulf %83, %84 : vector<16x1xf32>
    %86 = arith.mulf %79, %79 : vector<16x128xf32>
    %cst_30 = arith.constant dense<0.000000e+00> : vector<16xf32>
    %87 = vector.multi_reduction <add>, %86, %cst_30 [1] : vector<16x128xf32> to vector<16xf32>
    %88 = vector.shape_cast %87 : vector<16xf32> to vector<16x1xf32>
    %cst_31 = arith.constant 3.125000e-02 : f32
    %89 = vector.broadcast %cst_31 : f32 to vector<16x1xf32>
    %90 = arith.mulf %88, %89 : vector<16x1xf32>
    %91 = arith.mulf %85, %85 : vector<16x1xf32>
    %92 = arith.subf %90, %91 : vector<16x1xf32>
    %cst_32 = arith.constant 0.000000e+00 : f32
    %93 = vector.broadcast %cst_32 : f32 to vector<16x1xf32>
    %94 = arith.maximumf %92, %93 : vector<16x1xf32>
    %95 = vector.broadcast %85 : vector<16x1xf32> to vector<16x128xf32>
    %96 = arith.subf %79, %95 : vector<16x128xf32>
    %cst_33 = arith.constant 9.99999974E-6 : f32
    %97 = vector.broadcast %cst_33 : f32 to vector<16x1xf32>
    %98 = arith.addf %94, %97 : vector<16x1xf32>
    %99 = math.rsqrt %98 : vector<16x1xf32>
    %100 = vector.broadcast %99 : vector<16x1xf32> to vector<16x128xf32>
    %101 = arith.mulf %96, %100 : vector<16x128xf32>
    %102 = vector.broadcast %80 : vector<1x128xf32> to vector<16x128xf32>
    %103 = arith.mulf %101, %102 : vector<16x128xf32>
    %104 = vector.broadcast %81 : vector<1x128xf32> to vector<16x128xf32>
    %105 = arith.addf %103, %104 : vector<16x128xf32>
    %106 = vector.extract_strided_slice %105 {offsets = [0, 0], sizes = [16, 32], strides = [1, 1]} : vector<16x128xf32> to vector<16x32xf32>
    %107 = arith.truncf %106 : vector<16x32xf32> to vector<16x32xbf16>
    %c0_34 = arith.constant 0 : index
    %c0_35 = arith.constant 0 : index
    %c0_36 = arith.constant 0 : index
    %108 = vector.load %arg7[%c0_34, %c0_35, %c0_36] : memref<1x32x128xbf16, #tpu.memory_space<vmem>>, vector<1x32x128xbf16>
    %109 = vector.shape_cast %108 : vector<1x32x128xbf16> to vector<32x128xbf16>
    %cst_37 = arith.constant dense<0.000000e+00> : vector<16x128xf32>
    %110 = tpu.matmul %107, %109, %cst_37 {dimension_numbers = #tpu.dot_dimension_numbers<[1], [0], [0], [1], [0, 0, 1, 1], [], []>} : vector<16x32xbf16>, vector<32x128xbf16>, vector<16x128xf32> -> vector<16x128xf32>
    %111 = vector.extract_strided_slice %78 {offsets = [0, 0], sizes = [1, 128], strides = [1, 1]} : vector<8x128xf32> to vector<1x128xf32>
    %112 = vector.broadcast %111 : vector<1x128xf32> to vector<16x128xf32>
    %113 = arith.addf %110, %112 : vector<16x128xf32>
    %cst_38 = arith.constant 0.000000e+00 : f32
    %114 = vector.broadcast %cst_38 : f32 to vector<16x128xf32>
    %115 = arith.maximumf %113, %114 : vector<16x128xf32>
    %116 = vector.extract_strided_slice %115 {offsets = [0, 0], sizes = [16, 64], strides = [1, 1]} : vector<16x128xf32> to vector<16x64xf32>
    %117 = arith.truncf %116 : vector<16x64xf32> to vector<16x64xbf16>
    %c0_39 = arith.constant 0 : index
    %c0_40 = arith.constant 0 : index
    %c0_41 = arith.constant 0 : index
    %118 = vector.load %arg8[%c0_39, %c0_40, %c0_41] : memref<1x64x128xbf16, #tpu.memory_space<vmem>>, vector<1x64x128xbf16>
    %119 = vector.shape_cast %118 : vector<1x64x128xbf16> to vector<64x128xbf16>
    %cst_42 = arith.constant dense<0.000000e+00> : vector<16x128xf32>
    %120 = tpu.matmul %117, %119, %cst_42 {dimension_numbers = #tpu.dot_dimension_numbers<[1], [0], [0], [1], [0, 0, 1, 1], [], []>} : vector<16x64xbf16>, vector<64x128xbf16>, vector<16x128xf32> -> vector<16x128xf32>
    %121 = vector.extract_strided_slice %78 {offsets = [1, 0], sizes = [1, 128], strides = [1, 1]} : vector<8x128xf32> to vector<1x128xf32>
    %122 = vector.broadcast %121 : vector<1x128xf32> to vector<16x128xf32>
    %123 = arith.addf %120, %122 : vector<16x128xf32>
    %124 = arith.addf %123, %105 : vector<16x128xf32>
    %125 = vector.extract_strided_slice %78 {offsets = [4, 0], sizes = [1, 128], strides = [1, 1]} : vector<8x128xf32> to vector<1x128xf32>
    %126 = vector.extract_strided_slice %78 {offsets = [5, 0], sizes = [1, 128], strides = [1, 1]} : vector<8x128xf32> to vector<1x128xf32>
    %cst_43 = arith.constant dense<0.000000e+00> : vector<16xf32>
    %127 = vector.multi_reduction <add>, %124, %cst_43 [1] : vector<16x128xf32> to vector<16xf32>
    %128 = vector.shape_cast %127 : vector<16xf32> to vector<16x1xf32>
    %cst_44 = arith.constant 3.125000e-02 : f32
    %129 = vector.broadcast %cst_44 : f32 to vector<16x1xf32>
    %130 = arith.mulf %128, %129 : vector<16x1xf32>
    %131 = arith.mulf %124, %124 : vector<16x128xf32>
    %cst_45 = arith.constant dense<0.000000e+00> : vector<16xf32>
    %132 = vector.multi_reduction <add>, %131, %cst_45 [1] : vector<16x128xf32> to vector<16xf32>
    %133 = vector.shape_cast %132 : vector<16xf32> to vector<16x1xf32>
    %cst_46 = arith.constant 3.125000e-02 : f32
    %134 = vector.broadcast %cst_46 : f32 to vector<16x1xf32>
    %135 = arith.mulf %133, %134 : vector<16x1xf32>
    %136 = arith.mulf %130, %130 : vector<16x1xf32>
    %137 = arith.subf %135, %136 : vector<16x1xf32>
    %cst_47 = arith.constant 0.000000e+00 : f32
    %138 = vector.broadcast %cst_47 : f32 to vector<16x1xf32>
    %139 = arith.maximumf %137, %138 : vector<16x1xf32>
    %140 = vector.broadcast %130 : vector<16x1xf32> to vector<16x128xf32>
    %141 = arith.subf %124, %140 : vector<16x128xf32>
    %cst_48 = arith.constant 9.99999974E-6 : f32
    %142 = vector.broadcast %cst_48 : f32 to vector<16x1xf32>
    %143 = arith.addf %139, %142 : vector<16x1xf32>
    %144 = math.rsqrt %143 : vector<16x1xf32>
    %145 = vector.broadcast %144 : vector<16x1xf32> to vector<16x128xf32>
    %146 = arith.mulf %141, %145 : vector<16x128xf32>
    %147 = vector.broadcast %125 : vector<1x128xf32> to vector<16x128xf32>
    %148 = arith.mulf %146, %147 : vector<16x128xf32>
    %149 = vector.broadcast %126 : vector<1x128xf32> to vector<16x128xf32>
    %150 = arith.addf %148, %149 : vector<16x128xf32>
    %151 = vector.broadcast %6 : vector<16x1xf32> to vector<16x128xf32>
    %152 = arith.mulf %150, %151 : vector<16x128xf32>
    %153 = vector.shape_cast %152 : vector<16x128xf32> to vector<2x8x128xf32>
    %c0_49 = arith.constant 0 : index
    %c0_50 = arith.constant 0 : index
    %c0_51 = arith.constant 0 : index
    %154 = vector.load %arg10[%c0_49, %c0_50, %c0_51] : memref<2x8x128xf32, #tpu.memory_space<vmem>>, vector<2x8x128xf32>
    tpu.vector_store %arg10[%c0_49, %c0_50, %c0_51], %153 {strides = array<i32>} : memref<2x8x128xf32, #tpu.memory_space<vmem>>, vector<2x8x128xf32>,
    return
  }
  func.func @transform_0(%arg0: i32, %arg1: i32) -> (i32, i32, i32) {
    %c0_i32 = arith.constant 0 : i32
    %c0_i32_0 = arith.constant 0 : i32
    %c0_i32_1 = arith.constant 0 : i32
    return %arg0, %c0_i32, %c0_i32_0 : i32, i32, i32
  }
  func.func @transform_1(%arg0: i32, %arg1: i32) -> (i32, i32, i32) {
    %c0_i32 = arith.constant 0 : i32
    %c0_i32_0 = arith.constant 0 : i32
    %c0_i32_1 = arith.constant 0 : i32
    return %arg0, %c0_i32, %c0_i32_0 : i32, i32, i32
  }
  func.func @transform_2(%arg0: i32, %arg1: i32) -> (i32, i32, i32) {
    %c0_i32 = arith.constant 0 : i32
    %c0_i32_0 = arith.constant 0 : i32
    %c0_i32_1 = arith.constant 0 : i32
    return %arg0, %c0_i32, %c0_i32_0 : i32, i32, i32
  }
  func.func @transform_3(%arg0: i32, %arg1: i32) -> (i32, i32, i32) {
    %c0_i32 = arith.constant 0 : i32
    %c0_i32_0 = arith.constant 0 : i32
    %c0_i32_1 = arith.constant 0 : i32
    return %arg1, %c0_i32, %c0_i32_0 : i32, i32, i32
  }
  func.func @transform_4(%arg0: i32, %arg1: i32) -> (i32, i32, i32, i32) {
    %c0_i32 = arith.constant 0 : i32
    %c0_i32_0 = arith.constant 0 : i32
    %c0_i32_1 = arith.constant 0 : i32
    %c0_i32_2 = arith.constant 0 : i32
    return %arg1, %c0_i32, %c0_i32_0, %c0_i32_1 : i32, i32, i32, i32
  }
  func.func @transform_5(%arg0: i32, %arg1: i32) -> (i32, i32, i32) {
    %c0_i32 = arith.constant 0 : i32
    %c0_i32_0 = arith.constant 0 : i32
    %c0_i32_1 = arith.constant 0 : i32
    return %arg1, %c0_i32, %c0_i32_0 : i32, i32, i32
  }
  func.func @transform_6(%arg0: i32, %arg1: i32) -> (i32, i32, i32) {
    %c0_i32 = arith.constant 0 : i32
    %c0_i32_0 = arith.constant 0 : i32
    %c0_i32_1 = arith.constant 0 : i32
    return %arg1, %c0_i32, %c0_i32_0 : i32, i32, i32
  }
  func.func @transform_7(%arg0: i32, %arg1: i32) -> (i32, i32, i32) {
    %c0_i32 = arith.constant 0 : i32
    %c0_i32_0 = arith.constant 0 : i32
    %c0_i32_1 = arith.constant 0 : i32
    return %arg1, %c0_i32, %c0_i32_0 : i32, i32, i32
  }
  func.func @transform_8(%arg0: i32, %arg1: i32) -> (i32, i32, i32) {
    %c0_i32 = arith.constant 0 : i32
    %c0_i32_0 = arith.constant 0 : i32
    %c0_i32_1 = arith.constant 0 : i32
    return %arg0, %c0_i32, %c0_i32_0 : i32, i32, i32
  }
}

</mosaic_0001>

<bundles_post_ra>
// kernel: base_model_forward.1
= control target key start
LH: loop header
LB: loop body
LE: loop exit
PB: predicated region body
PF: predicated region fallthrough
CT: control target
= control target key end

     0   :  { %s3451_s27 = smov 0   ;;  %s3453_s28 = smov 0   ;;  %s3907_s0 = inlined_call_operand.vmem [shape: f32[2,8,128], index: 0, kind: input, shape index: {}]   ;;  %s3908_s1 = inlined_call_operand.vmem [shape: f32[2,1,8], index: 1, kind: input, shape index: {}]   ;;  %s3909_s2 = inlined_call_operand.vmem [shape: f32[2,8,1], index: 2, kind: input, shape index: {}]   ;;  %s3910_s3 = inlined_call_operand.vmem [shape: bf16[2,32,384], index: 3, kind: input, shape index: {}]   ;;  %s3911_s4 = inlined_call_operand.vmem [shape: bf16[2,4,32,128], index: 4, kind: input, shape index: {}]   ;;  %s3912_s5 = inlined_call_operand.vmem [shape: bf16[2,32,128], index: 5, kind: input, shape index: {}]   ;;  %s3913_s6 = inlined_call_operand.vmem [shape: bf16[2,64,128], index: 6, kind: input, shape index: {}]   ;;  %s3914_s7 = inlined_call_operand.vmem [shape: f32[2,8,128], index: 7, kind: input, shape index: {}]   ;;  %s3915_s8 = inlined_call_operand.vmem [shape: f32[2,8,128], index: 8, kind: output, shape index: {}]  }
   0x1   :  { %s3455_s29 = smov 0  }
   0x2 LB: > { %s27_s30 = sadd.s32 1, %s3392_s28  ;;  %p2981_p0 = scmp.ge.s32.totalorder %s3396_s29, 1  ;;  %s3396_s29 = sphi %s3455_s29, %s18_s29   ;;  %s3392_s28 = sphi %s3453_s28, %s3917_s28   ;;  %s3388_s27 = sphi %s3451_s27, %s3916_s27  }
   0x3   : > { %p28_p1 = scmp.ge.s32.totalorder %s27_s30, 2  ;;  %p345_p2 = scmp.lt.s32.totalorder %s3396_s29, 3 }
   0x5   : > { %s3919_s30 = smov (%p28_p1, %s27_s30), 0  ;;  %p346_p3 = pnand %p2981_p0, %p345_p2 }
   0x6   : > { %p429_p4 = scmp.lt.s32.totalorder (!%p346_p3), %s3388_s27, 1  ;;  %p2990_p5 = scmp.ne.s32.totalorder (!%p346_p3), %s3388_s27, 0 }
   0x7   : > { %349 = sbr.rel (%p346_p3) target bundleno = 2220 (0x8ac), region = 52 }
   0xe   : > { %s430_s9 = scalar_select %p429_p4, %s3388_s27, 1 }
   0xf   : > { %463 = sbr.rel (%p2990_p5) target bundleno = 22 (0x16), region = 56  ;;  %v464_v0 = vld [vmem:[%s3907_s0] sm:$0xff] (!%p2990_p5)  ;;  %v465_v1 = vld [vmem:[%s3907_s0 + $0x8] sm:$0xff] (!%p2990_p5) }
  0x10   : > { %s3275_s10 = smul.u32 48, %s430_s9  ;;  %s3057_s11 = sshll.u32 %s430_s9, 6  ;;  %466 = vst [vmem:[%s3915_s8] sm:$0xff] (!%p2990_p5), %v464_v0  ;;  %467 = vst [vmem:[%s3915_s8 + $0x8] sm:$0xff] (!%p2990_p5), %v465_v1 }
  0x11   : > { %s3472_s14 = scalar_lea.vmem %s3911_s4, %s3057_s11  ;;  %s3058_s15 = sshll.u32 %s430_s9, 4 }
  0x12   : > { %s3477_s18 = scalar_lea.vmem %s3910_s3, %s3275_s10  ;;  %s3482_s21 = scalar_lea.vmem %s3912_s5, %s3058_s15 }
  0x13   : > { %s3059_s22 = sshll.u32 %s430_s9, 5  ;;  %s2989_s23 = sshll.u32 %s430_s9, 3 }
  0x14   : > { %s3487_s26 = scalar_lea.vmem %s3913_s6, %s3059_s22  ;;  %s3492_s13 = scalar_lea.vmem %s3914_s7, %s2989_s23 }
  0x16 PF: > { %v3310_v2 = vld [vmem:[%s3477_s18 + $0x4] ss:$12 sps:$4 sm:$0xff]   ;;  %v3312_v3 = vld [vmem:[%s3477_s18] ss:$12 sps:$4 sm:$0xff]   ;;  %v3398_v4 = vmov 0   ;;  %vm515_vm0 = vcmask 261120   ;;  %v639_v21 = vlaneseq }
  0x17   : > { %551 = vmatprep.mubr.bf16.mxu0 %v3398_v4  ;;  %3308 = vset.pattern.permute.xlu0 %v3398_v4  ;;  %v3313_v5 = vld [vmem:[%s3477_s18 + $0x1c] ss:$12 sps:$4 sm:$0xff]   ;;  %v3315_v6 = vld [vmem:[%s3477_s18 + $0x18] ss:$12 sps:$4 sm:$0xff]   ;;  %s3399_s11 = smov 32   ;;  %s3400_s12 = smov 96   ;;  %v3551_v36 = vpack.i.b16 %v3398_v4, %v3398_v4 }
  0x18   : > { %519 = vmatprep.subr.bf16.mxu0 %v3310_v2  ;;  %v468_v7 = vld [vmem:[%s3915_s8] sm:$0xff]  ;;  %3309 = vset.pattern.permute.xlu1 %v3398_v4  ;;  %v469_v8 = vld [vmem:[%s3915_s8 + $0x8] sm:$0xff]  ;;  %s3401_s10 = smov 64   ;;  %v3402_v17 = vmov 0.0   ;;  %vm3403_vm1 = vmmov 0   ;;  %v3544_v24 = vshrl.u32 %v639_v21, 7 }
  0x19   : > { %520 = vmatpush1.bf16.msra.mxu0 %v3312_v3  ;;  %v474_v9 = vpack.c.bf16 %v469_v8, %v468_v7  ;;  %v3316_v16 = vld [vmem:[%s3477_s18 + $0x8] ss:$12 sps:$4 sm:$0xff]   ;;  %3119 = vmatprep.subr.bf16.mxu1 %v3402_v17  ;;  %v3317_v18 = vld [vmem:[%s3477_s18 + $0x20] ss:$12 sps:$4 sm:$0xff]   ;;  %v3404_v19 = vmov 1983009808  }
  0x1a   : > { %521 = vmatprep.subr.bf16.mxu0 %v3313_v5  ;;  %3120 = vmatpush3.bf16.msra.mxu1 %v3316_v16  ;;  %v637_v20 = vunpack.c.l.s4 %v3404_v19  ;;  %v3405_v26 = vmov 1934713408   ;;  %vm1837_vm2 = vcmask 64512   ;;  %vm1937_vm3 = vcmask 1043456  }
  0x1b   : > { %3121 = vmatprep.subr.bf16.mxu1 %v3402_v17  ;;  %3123 = vmatprep.mubr.msk.bf16.mxu1 %vm3403_vm1, %v3402_v17  ;;  %v668_v27 = vunpack.c.l.s4 %v3405_v26  ;;  %vm2722_vm4 = vcmask 523264  }
  0x1c   : > { %v638_v23 = vunpack.c.0.s8 %v637_v20 }
  0x1d   : > { %522 = vmatpush1.bf16.msra.mxu0 %v3315_v6  ;;  %v669_v32 = vunpack.c.0.s8 %v668_v27 }
  0x1e   : > { %3127 = vmatprep.subr.bf16.mxu0 %v3402_v17  ;;  %3122 = vmatpush3.bf16.msra.mxu1 %v3317_v18  ;;  %v3547_v29 = vsub.s32 %v638_v23, %v3544_v24 }
  0x1f   : > { %3133 = vmatprep.subr.bf16.mxu1 %v3402_v17  ;;  %v3555_v41 = vsub.s32 %v669_v32, %v3544_v24 }
  0x20   : > { %2997 = vmatmul.mubr.msk.bf16.vlgmr.msra.gmra.mrb[0].mxu0 %vm515_vm0, %v474_v9 }
  0x21   : > { %3129 = vmatprep.mubr.msk.bf16.mxu0 %vm3403_vm1, %v3402_v17  ;;  %3124 = vmatmul.mubr.msk.bf16.vlgmr.msra.gmra.mrb[0].mxu1 %vm515_vm0, %v474_v9 }
  0x22   : > { %3135 = vmatprep.mubr.msk.bf16.mxu1 %vm3403_vm1, %v3402_v17 }
  0xf3   : > { %v553_v10 = vpop.f32.mrb[0].mxu0 }
  0xf4   : > { %v555_v11 = vpop.f32.mrb[1].mxu0 }
  0xf5   : > { %v557_v12 = vpop.f32.mrb[2].mxu0 }
  0xf6   : > { %v3520_v13 = vpack.c.bf16 %v557_v12, %v553_v10  ;;  %v559_v14 = vpop.f32.mrb[3].mxu0 }
  0xf7   : > { %v604_v15 = vpack.c.bf16 %v559_v14, %v555_v11 }
  0xf8   : > { %v617_v48 = vshrl.u32 %v3520_v13, 16 }
  0xf9   : > { %896 = vrot.lane.b32.xlu1 %v604_v15, %s3399_s11  ;;  %892 = vrot.lane.b32.xlu0 %v604_v15, %s3400_s12  ;;  %v902_v34 = vshrl.u32 %v604_v15, 16 }
  0xfd   : > { %607 = vrot.lane.b32.xlu1 %v3520_v13, %s3400_s12  ;;  %894 = vrot.lane.b32.xlu0 %v604_v15, %s3401_s10 }
 0x101   : > { %611 = vrot.lane.b32.xlu1 %v3520_v13, %s3399_s11  ;;  %609 = vrot.lane.b32.xlu0 %v3520_v13, %s3401_s10 }
 0x16b   : > { %v897_v22 = vpop.permute.xlu1 %896  ;;  %v893_v25 = vpop.permute.xlu0 %892 }
 0x16c   : > { %v903_v28 = vshrl.u32 %v893_v25, 16  ;;  %v900_v30 = vpack.i.b16 %v893_v25, %v604_v15  ;;  %v911_v35 = vshrl.u32 %v897_v22, 16 }
 0x16e   : > { %v904_v39 = vpack.i.b16 %v903_v28, %v902_v34  ;;  %v921_v40 = vrot.slane %v900_v30, %v3547_v29  ;;  %v914_v47 = vcombine.high %v900_v30, %v3551_v36 }
 0x16f   : > { %v608_v31 = vpop.permute.xlu1 %607  ;;  %v895_v33 = vpop.permute.xlu0 %894 }
 0x170   : > { %v908_v37 = vpack.i.b16 %v897_v22, %v895_v33  ;;  %v910_v38 = vshrl.u32 %v895_v33, 16  ;;  %v618_v49 = vshrl.u32 %v608_v31, 16  ;;  %v980_v51 = vcombine.high %v904_v39, %v3551_v36 }
 0x171   : > { %v987_v52 = vrot.slane %v904_v39, %v3547_v29  ;;  %v928_v63 = vrot.slane %v914_v47, %v3547_v29  ;;  %v615_v0 = vpack.i.b16 %v608_v31, %v3520_v13 }
 0x172   : > { %v912_v42 = vpack.i.b16 %v911_v35, %v910_v38  ;;  %v936_v43 = vrot.slane %v908_v37, %v3547_v29  ;;  %v929_v44 = vcombine.high %v908_v37, %v3551_v36  ;;  %v619_v1 = vpack.i.b16 %v618_v49, %v617_v48 }
 0x173   : > { %v612_v45 = vpop.permute.xlu1 %611  ;;  %v610_v46 = vpop.permute.xlu0 %609  ;;  %v994_v2 = vrot.slane %v980_v51, %v3547_v29  ;;  %v642_v13 = vrot.slane %v615_v0, %v3547_v29  ;;  %v635_v20 = vcombine.high %v615_v0, %v3551_v36 }
 0x174   : > { %v944_v50 = vcombine.low %v921_v40, %v936_v43  ;;  %v945_v53 = vcombine.high %v921_v40, %v936_v43  ;;  %v1002_v54 = vrot.slane %v912_v42, %v3547_v29  ;;  %v626_v56 = vshrl.u32 %v612_v45, 16 }
 0x175   : > { %v623_v57 = vpack.i.b16 %v612_v45, %v610_v46  ;;  %v625_v58 = vshrl.u32 %v610_v46, 16  ;;  %v943_v59 = vrot.slane %v929_v44, %v3547_v29  ;;  %v995_v3 = vcombine.high %v912_v42, %v3551_v36 }
 0x176   : > { %v952_v55 = vrot.slane %v944_v50, %v3555_v41  ;;  %v959_v60 = vrot.slane %v945_v53, %v3555_v41  ;;  %v1010_v61 = vcombine.low %v987_v52, %v1002_v54  ;;  %v1011_v62 = vcombine.high %v987_v52, %v1002_v54 }
 0x177   : > { %v627_v9 = vpack.i.b16 %v626_v56, %v625_v58  ;;  %v657_v10 = vrot.slane %v623_v57, %v3547_v29  ;;  %v960_v11 = vcombine.low %v928_v63, %v943_v59  ;;  %v961_v12 = vcombine.high %v928_v63, %v943_v59 }
 0x178   : > { %v1018_v5 = vrot.slane %v1010_v61, %v3555_v41  ;;  %v1025_v6 = vrot.slane %v1011_v62, %v3555_v41  ;;  %v1046_v7 = vcombine.low %v952_v55, %v959_v60  ;;  %v3003_v8 = vcombine.high %v952_v55, %v959_v60 }
 0x179   : > { %v701_v16 = vcombine.high %v619_v1, %v3551_v36  ;;  %v708_v21 = vrot.slane %v619_v1, %v3547_v29  ;;  %v1009_v22 = vrot.slane %v995_v3, %v3547_v29  ;;  %v665_v26 = vcombine.low %v642_v13, %v657_v10 }
 0x17a   : > { %v1071_v14 = vcombine.low %v1018_v5, %v1025_v6  ;;  %v3004_v15 = vcombine.high %v1018_v5, %v1025_v6  ;;  %v1053_v18 = vrot.slane %v1046_v7, %v3547_v29  ;;  %v1061_v19 = vrot.slane %v3003_v8, %v3547_v29 }
 0x17b   : > { %v666_v27 = vcombine.high %v642_v13, %v657_v10  ;;  %v716_v28 = vcombine.high %v627_v9, %v3551_v36  ;;  %v968_v30 = vrot.slane %v960_v11, %v3555_v41  ;;  %v975_v31 = vrot.slane %v961_v12, %v3555_v41 }
 0x17c   : > { %v1078_v23 = vrot.slane %v1071_v14, %v3547_v29  ;;  %v1086_v25 = vrot.slane %v3004_v15, %v3547_v29  ;;  %v650_v32 = vcombine.high %v623_v57, %v3551_v36  ;;  %v723_v33 = vrot.slane %v627_v9, %v3547_v29 }
 0x17d   : > { %v715_v34 = vrot.slane %v701_v16, %v3547_v29  ;;  %v673_v35 = vrot.slane %v665_v26, %v3555_v41  ;;  %v680_v37 = vrot.slane %v666_v27, %v3555_v41  ;;  %v1062_v38 = vcombine.low %v1053_v18, %v1061_v19 }
 0x17e   : > { %v1026_v39 = vcombine.low %v994_v2, %v1009_v22  ;;  %v730_v40 = vrot.slane %v716_v28, %v3547_v29  ;;  %v731_v42 = vcombine.low %v708_v21, %v723_v33  ;;  %v732_v43 = vcombine.high %v708_v21, %v723_v33 }
 0x17f   : > { %v1027_v44 = vcombine.high %v994_v2, %v1009_v22  ;;  %v767_v45 = vcombine.low %v673_v35, %v680_v37  ;;  %v2999_v46 = vcombine.high %v673_v35, %v680_v37  ;;  %v1087_v47 = vcombine.low %v1078_v23, %v1086_v25 }
 0x180   : > { %v1096_v48 = vcombine.low %v968_v30, %v975_v31  ;;  %v664_v49 = vrot.slane %v650_v32, %v3547_v29  ;;  %v739_v50 = vrot.slane %v731_v42, %v3555_v41  ;;  %v746_v51 = vrot.slane %v732_v43, %v3555_v41 }
 0x181   : > { %v649_v52 = vrot.slane %v635_v20, %v3547_v29  ;;  %v747_v53 = vcombine.low %v715_v34, %v730_v40  ;;  %v748_v54 = vcombine.high %v715_v34, %v730_v40  ;;  %v1069_v55 = vrot.slane %v1062_v38, %v3555_v41 }
 0x182   : > { %v774_v56 = vrot.slane %v767_v45, %v3547_v29  ;;  %v782_v57 = vrot.slane %v2999_v46, %v3547_v29  ;;  %v792_v58 = vcombine.low %v739_v50, %v746_v51  ;;  %v3000_v59 = vcombine.high %v739_v50, %v746_v51 }
 0x183   : > { %v1034_v60 = vrot.slane %v1026_v39, %v3555_v41  ;;  %v1041_v61 = vrot.slane %v1027_v44, %v3555_v41  ;;  %v3005_v62 = vcombine.high %v968_v30, %v975_v31  ;;  %v1094_v63 = vrot.slane %v1087_v47, %v3555_v41 }
 0x184   : > { %v1103_v0 = vrot.slane %v1096_v48, %v3547_v29  ;;  %v681_v1 = vcombine.low %v649_v52, %v664_v49  ;;  %v799_v2 = vrot.slane %v792_v58, %v3547_v29  ;;  %v807_v3 = vrot.slane %v3000_v59, %v3547_v29 }
 0x185   : > { %v682_v5 = vcombine.high %v649_v52, %v664_v49  ;;  %v755_v6 = vrot.slane %v747_v53, %v3555_v41  ;;  %v762_v7 = vrot.slane %v748_v54, %v3555_v41  ;;  %v1148_v8 = vpack.i.b16 %v1094_v63, %v1069_v55 }
 0x186   : > { %v783_v9 = vcombine.low %v774_v56, %v782_v57  ;;  %v808_v10 = vcombine.low %v799_v2, %v807_v3  ;;  %v1149_v11 = vshrl.u32 %v1069_v55, 16  ;;  %v1150_v12 = vshrl.u32 %v1094_v63, 16 }
 0x187   : > { %v1121_v14 = vcombine.low %v1034_v60, %v1041_v61  ;;  %v3006_v15 = vcombine.high %v1034_v60, %v1041_v61  ;;  %v1453_v13 = vsel %vm515_vm0, %v1148_v8, 0  ;;  %v1095_v16 = vcombine.high %v1094_v63, %v3398_v4 }
 0x188   : > { %v1111_v18 = vrot.slane %v3005_v62, %v3547_v29  ;;  %3128 = vmatpush3.bf16.xpose.msra.mxu0 %v1453_v13  ;;  %v1151_v19 = vpack.i.b16 %v1150_v12, %v1149_v11  ;;  %v815_v20 = vrot.slane %v808_v10, %v3555_v41  ;;  %v1070_v21 = vcombine.high %v1069_v55, %v3398_v4 }
 0x189   : > { %v689_v22 = vrot.slane %v681_v1, %v3555_v41  ;;  %v696_v23 = vrot.slane %v682_v5, %v3555_v41  ;;  %3139 = vmatprep.subr.bf16.mxu0 %v3402_v17  ;;  %v790_v25 = vrot.slane %v783_v9, %v3555_v41  ;;  %v842_v26 = vcombine.low %v755_v6, %v762_v7 }
 0x18a   : > { %v1499_v27 = vsel %vm515_vm0, %v1151_v19, 0  ;;  %v1156_v28 = vshrl.u32 %v1095_v16, 16  ;;  %v3002_v30 = vcombine.high %v755_v6, %v762_v7  ;;  %v1154_v31 = vpack.i.b16 %v1095_v16, %v1070_v21 }
 0x18b   : > { %3134 = vmatpush3.bf16.xpose.msra.mxu1 %v1499_v27  ;;  %v1128_v32 = vrot.slane %v1121_v14, %v3547_v29  ;;  %v1136_v33 = vrot.slane %v3006_v15, %v3547_v29  ;;  %v871_v34 = vshrl.u32 %v815_v20, 16  ;;  %v1155_v35 = vshrl.u32 %v1070_v21, 16  ;;  %v596_v27 = vpop.f32.mrb[0].mxu1 }
 0x18c   : > { %3145 = vmatprep.subr.bf16.mxu1 %v3402_v17  ;;  %v1112_v37 = vcombine.low %v1103_v0, %v1111_v18  ;;  %v817_v38 = vcombine.low %v689_v22, %v696_v23  ;;  %v869_v39 = vpack.i.b16 %v815_v20, %v790_v25  ;;  %v3001_v42 = vcombine.high %v689_v22, %v696_v23 }
 0x18d   : > { %v1137_v40 = vcombine.low %v1128_v32, %v1136_v33  ;;  %v870_v43 = vshrl.u32 %v790_v25, 16  ;;  %v1157_v44 = vpack.i.b16 %v1156_v28, %v1155_v35  ;;  %v849_v45 = vrot.slane %v842_v26, %v3547_v29  ;;  %v3125_v28 = vpop.f32.mrb[1].mxu1  ;;  %v3019_v33 = vld [vmem:[%s3908_s1] ss:$0 sm:$0xff] }
 0x18e   : > { %v857_v46 = vrot.slane %v3002_v30, %v3547_v29  ;;  %v1545_v47 = vsel %vm515_vm0, %v1154_v31, 0  ;;  %v816_v50 = vcombine.high %v815_v20, %v3398_v4  ;;  %v1119_v51 = vrot.slane %v1112_v37, %v3555_v41  ;;  %v599_v30 = vpop.f32.mrb[2].mxu1 }
 0x18f   : > { %3130 = vmatmul.mubr.msk.bf16.vlgmr.msra.gmra.mrb[4].mxu0 %vm515_vm0, %v869_v39  ;;  %v1144_v48 = vrot.slane %v1137_v40, %v3555_v41  ;;  %v872_v49 = vpack.i.b16 %v871_v34, %v870_v43  ;;  %v824_v52 = vrot.slane %v817_v38, %v3547_v29  ;;  %v832_v53 = vrot.slane %v3001_v42, %v3547_v29  ;;  %v3126_v32 = vpop.f32.mrb[3].mxu1 }
 0x190   : > { %3140 = vmatpush3.bf16.xpose.msra.mxu0 %v1545_v47  ;;  %3141 = vmatprep.mubr.msk.bf16.mxu0 %vm3403_vm1, %v3402_v17  ;;  %v1591_v54 = vsel %vm515_vm0, %v1157_v44, 0  ;;  %v791_v55 = vcombine.high %v790_v25, %v3398_v4  ;;  %v858_v58 = vcombine.low %v849_v45, %v857_v46  ;;  %v877_v59 = vshrl.u32 %v816_v50, 16 }
 0x191   : > { %3151 = vmatprep.subr.bf16.mxu0 %v3402_v17  ;;  %v1162_v56 = vshrl.u32 %v1144_v48, 16  ;;  %v1160_v57 = vpack.i.b16 %v1144_v48, %v1119_v51  ;;  %v1161_v60 = vshrl.u32 %v1119_v51, 16  ;;  %v833_v62 = vcombine.low %v824_v52, %v832_v53 }
 0x192   : > { %3136 = vmatmul.mubr.msk.bf16.vlgmr.msra.gmra.mrb[4].mxu1 %vm515_vm0, %v872_v49  ;;  %v875_v61 = vpack.i.b16 %v816_v50, %v791_v55  ;;  %v876_v63 = vshrl.u32 %v791_v55, 16  ;;  %v1145_v1 = vcombine.high %v1144_v48, %v3398_v4  ;;  %v865_v5 = vrot.slane %v858_v58, %v3555_v41 }
 0x193   : > { %3146 = vmatpush3.bf16.xpose.msra.mxu1 %v1591_v54  ;;  %3147 = vmatprep.mubr.msk.bf16.mxu1 %vm3403_vm1, %v3402_v17  ;;  %v1163_v0 = vpack.i.b16 %v1162_v56, %v1161_v60  ;;  %v1637_v2 = vsel %vm515_vm0, %v1160_v57, 0  ;;  %v1120_v6 = vcombine.high %v1119_v51, %v3398_v4  ;;  %v840_v8 = vrot.slane %v833_v62, %v3555_v41 }
 0x194   : > { %3157 = vmatprep.subr.bf16.mxu1 %v3402_v17  ;;  %v878_v3 = vpack.i.b16 %v877_v59, %v876_v63  ;;  %v1168_v9 = vshrl.u32 %v1145_v1, 16  ;;  %v883_v11 = vshrl.u32 %v865_v5, 16  ;;  %v866_v19 = vcombine.high %v865_v5, %v3398_v4  ;;  %v3020_v59 = vld [vmem:[%s3908_s1 + $0x1] ss:$0 sm:$0xff] }
 0x195   : > { %v1683_v7 = vsel %vm515_vm0, %v1163_v0, 0  ;;  %v1166_v10 = vpack.i.b16 %v1145_v1, %v1120_v6  ;;  %v1167_v12 = vshrl.u32 %v1120_v6, 16  ;;  %v881_v14 = vpack.i.b16 %v865_v5, %v840_v8 }
 0x196   : > { %v882_v15 = vshrl.u32 %v840_v8, 16  ;;  %v841_v21 = vcombine.high %v840_v8, %v3398_v4  ;;  %v889_v22 = vshrl.u32 %v866_v19, 16  ;;  %v3670_v31 = vpack.c.bf16 %v599_v30, %v596_v27 }
 0x197   : > { %3142 = vmatmul.mubr.msk.bf16.vlgmr.msra.gmra.mrb[8].mxu0 %vm515_vm0, %v875_v61  ;;  %v1169_v13 = vpack.i.b16 %v1168_v9, %v1167_v12  ;;  %v1729_v16 = vsel %vm515_vm0, %v1166_v10, 0 }
 0x198   : > { %3152 = vmatpush3.bf16.xpose.msra.mxu0 %v1637_v2  ;;  %3153 = vmatprep.mubr.msk.bf16.mxu0 %vm3403_vm1, %v3402_v17  ;;  %v884_v18 = vpack.i.b16 %v883_v11, %v882_v15  ;;  %v887_v23 = vpack.i.b16 %v866_v19, %v841_v21  ;;  %v888_v25 = vshrl.u32 %v841_v21, 16 }
 0x199   : > { %3163 = vmatprep.subr.bf16.mxu0 %v3402_v17  ;;  %v1775_v20 = vsel %vm515_vm0, %v1169_v13, 0 }
 0x19a   : > { %3148 = vmatmul.mubr.msk.bf16.vlgmr.msra.gmra.mrb[8].mxu1 %vm515_vm0, %v878_v3  ;;  %v890_v26 = vpack.i.b16 %v889_v22, %v888_v25 }
 0x19b   : > { %3158 = vmatpush3.bf16.xpose.msra.mxu1 %v1683_v7  ;;  %3159 = vmatprep.mubr.msk.bf16.mxu1 %vm3403_vm1, %v3402_v17 }
 0x19c   : > { %3169 = vmatprep.subr.bf16.mxu1 %v3402_v17 }
 0x19f   : > { %3154 = vmatmul.mubr.msk.bf16.vlgmr.msra.gmra.mrb[12].mxu0 %vm515_vm0, %v881_v14 }
 0x1a0   : > { %3164 = vmatpush3.bf16.xpose.msra.mxu0 %v1729_v16  ;;  %3165 = vmatprep.mubr.msk.bf16.mxu0 %vm3403_vm1, %v3402_v17 }
 0x1a1   : > { %3175 = vmatprep.subr.bf16.mxu0 %v3402_v17 }
 0x1a2   : > { %3160 = vmatmul.mubr.msk.bf16.vlgmr.msra.gmra.mrb[12].mxu1 %vm515_vm0, %v884_v18 }
 0x1a3   : > { %3170 = vmatpush3.bf16.xpose.msra.mxu1 %v1775_v20  ;;  %3171 = vmatprep.mubr.msk.bf16.mxu1 %vm3403_vm1, %v3402_v17 }
 0x1a4   : > { %3181 = vmatprep.subr.bf16.mxu1 %v3402_v17 }
 0x1a7   : > { %3166 = vmatmul.mubr.msk.bf16.vlgmr.msra.gmra.mrb[16].mxu0 %vm515_vm0, %v887_v23 }
 0x1a8   : > { %3177 = vmatprep.mubr.msk.bf16.mxu0 %vm3403_vm1, %v3402_v17 }
 0x1aa   : > { %3172 = vmatmul.mubr.msk.bf16.vlgmr.msra.gmra.mrb[16].mxu1 %vm515_vm0, %v890_v26 }
 0x1ab   : > { %3183 = vmatprep.mubr.msk.bf16.mxu1 %vm3403_vm1, %v3402_v17 }
 0x262   : > { %v1489_v34 = vpop.f32.mrb[4].mxu0 }
 0x263   : > { %v1829_v35 = vadd.f32 %v3019_v33, %v1489_v34  ;;  %v3131_v37 = vpop.f32.mrb[5].mxu0 }
 0x264   : > { %v1492_v38 = vpop.f32.mrb[6].mxu0 }
 0x265   : > { %v1535_v39 = vpop.f32.mrb[4].mxu1  ;;  %v3132_v40 = vpop.f32.mrb[7].mxu0  ;;  %v1838_v42 = vsel %vm1837_vm2, %v1829_v35, -inf }
 0x266   : > { %v1830_v43 = vadd.f32 %v3019_v33, %v1535_v39  ;;  %v3137_v44 = vpop.f32.mrb[5].mxu1  ;;  %1839 = vmax.xlane.f32.xlu0 %v1838_v42 }
 0x267   : > { %v1538_v45 = vpop.f32.mrb[6].mxu1 }
 0x268   : > { %v3138_v46 = vpop.f32.mrb[7].mxu1  ;;  %v1841_v47 = vsel %vm1837_vm2, %v1830_v43, -inf }
 0x269   : > { %1842 = vmax.xlane.f32.xlu1 %v1841_v47 }
 0x26a   : > { %v1581_v48 = vpop.f32.mrb[8].mxu0 }
 0x26b   : > { %v3677_v49 = vadd.f32 %v3019_v33, %v1581_v48  ;;  %v3143_v50 = vpop.f32.mrb[9].mxu0 }
 0x26c   : > { %v1584_v51 = vpop.f32.mrb[10].mxu0 }
 0x26d   : > { %v1627_v52 = vpop.f32.mrb[8].mxu1  ;;  %v3144_v53 = vpop.f32.mrb[11].mxu0  ;;  %v1844_v54 = vsel %vm1837_vm2, %v3677_v49, -inf }
 0x26e   : > { %v1832_v55 = vadd.f32 %v3019_v33, %v1627_v52  ;;  %v3149_v56 = vpop.f32.mrb[9].mxu1  ;;  %1845 = vmax.xlane.f32.xlu0 %v1844_v54 }
 0x26f   : > { %v1630_v57 = vpop.f32.mrb[10].mxu1 }
 0x270   : > { %v3150_v58 = vpop.f32.mrb[11].mxu1  ;;  %v1847_v60 = vsel %vm1837_vm2, %v1832_v55, -inf }
 0x272   : > { %1848 = vmax.xlane.f32.xlu0 %v1847_v60  ;;  %v1673_v61 = vpop.f32.mrb[12].mxu0 }
 0x273   : > { %v1833_v62 = vadd.f32 %v3020_v59, %v1673_v61  ;;  %v3155_v63 = vpop.f32.mrb[13].mxu0 }
 0x274   : > { %v1676_v0 = vpop.f32.mrb[14].mxu0 }
 0x275   : > { %v1719_v1 = vpop.f32.mrb[12].mxu1  ;;  %v3156_v2 = vpop.f32.mrb[15].mxu0  ;;  %v1850_v3 = vsel %vm1837_vm2, %v1833_v62, -inf }
 0x276   : > { %v1834_v5 = vadd.f32 %v3020_v59, %v1719_v1  ;;  %v3161_v6 = vpop.f32.mrb[13].mxu1  ;;  %1851 = vmax.xlane.f32.xlu1 %v1850_v3 }
 0x277   : > { %v1722_v7 = vpop.f32.mrb[14].mxu1 }
 0x278   : > { %v3162_v8 = vpop.f32.mrb[15].mxu1  ;;  %v1853_v9 = vsel %vm1837_vm2, %v1834_v5, -inf }
 0x279   : > { %1854 = vmax.xlane.f32.xlu0 %v1853_v9 }
 0x27a   : > { %v1765_v10 = vpop.f32.mrb[16].mxu0 }
 0x27b   : > { %v1835_v11 = vadd.f32 %v3020_v59, %v1765_v10  ;;  %v3167_v12 = vpop.f32.mrb[17].mxu0 }
 0x27c   : > { %v1768_v14 = vpop.f32.mrb[18].mxu0 }
 0x27d   : > { %v1811_v15 = vpop.f32.mrb[16].mxu1  ;;  %v3168_v13 = vpop.f32.mrb[19].mxu0  ;;  %v1856_v16 = vsel %vm1837_vm2, %v1835_v11, -inf }
 0x27e   : > { %v1836_v18 = vadd.f32 %v3020_v59, %v1811_v15  ;;  %v3173_v19 = vpop.f32.mrb[17].mxu1  ;;  %1857 = vmax.xlane.f32.xlu1 %v1856_v16 }
 0x27f   : > { %v1814_v20 = vpop.f32.mrb[18].mxu1 }
 0x280   : > { %v3174_v21 = vpop.f32.mrb[19].mxu1  ;;  %v1859_v22 = vsel %vm1837_vm2, %v1836_v18, -inf }
 0x281   : > { %1860 = vmax.xlane.f32.xlu0 %v1859_v22 }
 0x28f   : > { %1171 = vrot.lane.b32.xlu1 %v3670_v31, %s3400_s12 }
 0x2f3   : > { %v1840_v23 = vpop.xlane.xlu0 %1839 }
 0x2f4   : > { %v1862_v25 = vsub.f32 %v1829_v35, %v1840_v23 }
 0x2f6   : > { %v1870_v26 = vmul.f32 1.442695, %v1862_v25  ;;  %v1843_v27 = vpop.xlane.xlu1 %1842 }
 0x2f7   : > { %v1863_v28 = vsub.f32 %v1830_v43, %v1843_v27 }
 0x2f8   : > { %3332 = vpow2.f32 %v1870_v26 }
 0x2f9   : > { %v1872_v30 = vmul.f32 1.442695, %v1863_v28 }
 0x2fb   : > { %3334 = vpow2.f32 %v1872_v30  ;;  %v1846_v35 = vpop.xlane.xlu0 %1845 }
 0x2fc   : > { %v1864_v39 = vsub.f32 %v3677_v49, %v1846_v35 }
 0x2fe   : > { %v1874_v43 = vmul.f32 1.442695, %v1864_v39 }
 0x2ff   : > { %v1849_v38 = vpop.xlane.xlu0 %1848 }
 0x300   : > { %v1865_v42 = vsub.f32 %v1832_v55, %v1849_v38  ;;  %3336 = vpow2.f32 %v1874_v43 }
 0x302   : > { %v3691_v32 = vpop.eup %3332  ;;  %v1876_v47 = vmul.f32 1.442695, %v1865_v42 }
 0x303   : > { %v1886_v33 = vsel %vm1837_vm2, %v3691_v32, 0.0  ;;  %v1852_v44 = vpop.xlane.xlu1 %1851 }
 0x304   : > { %1887 = vadd.xlane.f32.xlu1 %v1886_v33  ;;  %v1866_v48 = vsub.f32 %v1833_v62, %v1852_v44  ;;  %3338 = vpow2.f32 %v1876_v47 }
 0x305   : > { %v3695_v34 = vpop.eup %3334 }
 0x306   : > { %v1889_v37 = vsel %vm1837_vm2, %v3695_v34, 0.0  ;;  %v1855_v40 = vpop.xlane.xlu0 %1854  ;;  %v1878_v53 = vmul.f32 1.442695, %v1866_v48 }
 0x307   : > { %1890 = vadd.xlane.f32.xlu0 %v1889_v37  ;;  %v1867_v45 = vsub.f32 %v1834_v5, %v1855_v40 }
 0x309   : > { %v1880_v50 = vmul.f32 1.442695, %v1867_v45 }
 0x30a   : > { %v3704_v49 = vpop.eup %3336 }
 0x30b   : > { %v1858_v51 = vpop.xlane.xlu1 %1857  ;;  %3340 = vpow2.f32 %v1880_v50  ;;  %v1892_v58 = vsel %vm1837_vm2, %v3704_v49, 0.0 }
 0x30c   : > { %v1868_v54 = vsub.f32 %v1835_v11, %v1858_v51  ;;  %3342 = vpow2.f32 %v1878_v53  ;;  %v1181_v11 = vshrl.u32 %v3670_v31, 16 }
 0x30e   : > { %v1861_v46 = vpop.xlane.xlu0 %1860  ;;  %v1882_v57 = vmul.f32 1.442695, %v1868_v54  ;;  %v3706_v55 = vpop.eup %3338 }
 0x30f   : > { %v1869_v52 = vsub.f32 %v1836_v18, %v1861_v46  ;;  %v1895_v60 = vsel %vm1837_vm2, %v3706_v55, 0.0  ;;  %v1172_v5 = vpop.permute.xlu1 %1171 }
 0x310   : > { %v1182_v8 = vshrl.u32 %v1172_v5, 16  ;;  %v3729_v10 = vpack.i.b16 %v1172_v5, %v3670_v31 }
 0x311   : > { %v1884_v56 = vmul.f32 1.442695, %v1869_v52 }
 0x312   : > { %v3734_v16 = vpack.i.b16 %v1182_v8, %v1181_v11  ;;  %v1200_v18 = vrot.slane %v3729_v10, %v3547_v29 }
 0x313   : > { %3344 = vpow2.f32 %v1884_v56 }
 0x314   : > { %3346 = vpow2.f32 %v1882_v57  ;;  %v1266_v23 = vrot.slane %v3734_v16, %v3547_v29  ;;  %v1259_v11 = vcombine.high %v3734_v16, %v3551_v36 }
 0x315   : > { %1175 = vrot.lane.b32.xlu1 %v3670_v31, %s3399_s11  ;;  %v3710_v59 = vpop.eup %3340 }
 0x316   : > { %v3714_v61 = vpop.eup %3342  ;;  %v1901_v62 = vsel %vm1837_vm2, %v3710_v59, 0.0 }
 0x317   : > { %v1898_v0 = vsel %vm1837_vm2, %v3714_v61, 0.0 }
 0x31d   : > { %1173 = vrot.lane.b32.xlu0 %v3670_v31, %s3401_s10  ;;  %v3718_v63 = vpop.eup %3344 }
 0x31e   : > { %v3722_v1 = vpop.eup %3346  ;;  %v1907_v2 = vsel %vm1837_vm2, %v3718_v63, 0.0 }
 0x31f   : > { %v1904_v3 = vsel %vm1837_vm2, %v3722_v1, 0.0 }
 0x339   : > { %1893 = vadd.xlane.f32.xlu1 %v1892_v58 }
 0x33c   : > { %1896 = vadd.xlane.f32.xlu0 %v1895_v60 }
 0x33d   : > { %1902 = vadd.xlane.f32.xlu1 %v1901_v62 }
 0x340   : > { %1899 = vadd.xlane.f32.xlu0 %v1898_v0 }
 0x341   : > { %1908 = vadd.xlane.f32.xlu1 %v1907_v2 }
 0x344   : > { %1905 = vadd.xlane.f32.xlu0 %v1904_v3 }
 0x391   : > { %v1888_v6 = vpop.xlane.xlu1 %1887 }
 0x392   : > { %3348 = vrcp.f32 %v1888_v6 }
 0x394   : > { %v1891_v7 = vpop.xlane.xlu0 %1890 }
 0x395   : > { %v1176_v9 = vpop.permute.xlu1 %1175  ;;  %3350 = vrcp.f32 %v1891_v7 }
 0x396   : > { %v1190_v14 = vshrl.u32 %v1176_v9, 16 }
 0x398   : > { %v1174_v12 = vpop.permute.xlu0 %1173 }
 0x399   : > { %v3732_v15 = vpack.i.b16 %v1176_v9, %v1174_v12  ;;  %v1189_v13 = vshrl.u32 %v1174_v12, 16 }
 0x39b   : > { %v1191_v19 = vpack.i.b16 %v1190_v14, %v1189_v13  ;;  %v1215_v20 = vrot.slane %v3732_v15, %v3547_v29  ;;  %v1208_v12 = vcombine.high %v3732_v15, %v3551_v36  ;;  %v1193_v13 = vcombine.high %v3729_v10, %v3551_v36 }
 0x39c   : > { %v3349_v47 = vpop.eup %3348  ;;  %v1273_v15 = vrot.slane %v1259_v11, %v3547_v29 }
 0x39d   : > { %v1223_v21 = vcombine.low %v1200_v18, %v1215_v20  ;;  %v1224_v22 = vcombine.high %v1200_v18, %v1215_v20  ;;  %v1281_v31 = vrot.slane %v1191_v19, %v3547_v29  ;;  %v1918_v53 = vmul.f32 %v3349_v47, %v3691_v32 }
 0x39e   : > { %v1274_v8 = vcombine.high %v1191_v19, %v3551_v36  ;;  %v1222_v16 = vrot.slane %v1208_v12, %v3547_v29  ;;  %v1207_v19 = vrot.slane %v1193_v13, %v3547_v29 }
 0x39f   : > { %v1231_v25 = vrot.slane %v1223_v21, %v3555_v41  ;;  %v1238_v26 = vrot.slane %v1224_v22, %v3555_v41  ;;  %v1289_v27 = vcombine.low %v1266_v23, %v1281_v31  ;;  %v1290_v28 = vcombine.high %v1266_v23, %v1281_v31  ;;  %v3351_v51 = vpop.eup %3350 }
 0x3a0   : > { %v1919_v60 = vmul.f32 %v3351_v51, %v3695_v34  ;;  %v1926_v7 = vpack.c.bf16 %v1918_v53, %v1918_v53  ;;  %v1288_v18 = vrot.slane %v1274_v8, %v3547_v29  ;;  %v1239_v22 = vcombine.low %v1207_v19, %v1222_v16 }
 0x3a1   : > { %v1325_v30 = vcombine.low %v1231_v25, %v1238_v26  ;;  %v3007_v33 = vcombine.high %v1231_v25, %v1238_v26  ;;  %v1297_v37 = vrot.slane %v1289_v27, %v3555_v41  ;;  %v1304_v35 = vrot.slane %v1290_v28, %v3555_v41 }
 0x3a2   : > { %v1927_v9 = vpack.c.bf16 %v1919_v60, %v1919_v60  ;;  %v1305_v20 = vcombine.low %v1273_v15, %v1288_v18  ;;  %v1306_v21 = vcombine.high %v1273_v15, %v1288_v18  ;;  %v1240_v23 = vcombine.high %v1207_v19, %v1222_v16  ;;  %v3318_v15 = vld [vmem:[%s3472_s14] sm:$0xff]   ;;  %v3319_v16 = vld [vmem:[%s3472_s14 + $0x10] sm:$0xff]   ;;  %v3321_v19 = vld [vmem:[%s3472_s14 + $0x18] sm:$0xff]  }
 0x3a3   : > { %v1332_v38 = vrot.slane %v1325_v30, %v3547_v29  ;;  %v1340_v39 = vrot.slane %v3007_v33, %v3547_v29  ;;  %v1350_v40 = vcombine.low %v1297_v37, %v1304_v35  ;;  %v3008_v42 = vcombine.high %v1297_v37, %v1304_v35 }
 0x3a4   : > { %v1313_v36 = vrot.slane %v1305_v20, %v3555_v41  ;;  %v1320_v10 = vrot.slane %v1306_v21, %v3555_v41  ;;  %v1247_v31 = vrot.slane %v1239_v22, %v3555_v41  ;;  %v1254_v25 = vrot.slane %v1240_v23, %v3555_v41 }
 0x3a5   : > { %v1341_v43 = vcombine.low %v1332_v38, %v1340_v39  ;;  %v1357_v44 = vrot.slane %v1350_v40, %v3547_v29  ;;  %v1365_v45 = vrot.slane %v3008_v42, %v3547_v29 }
 0x3a6   : > { %v1400_v26 = vcombine.low %v1313_v36, %v1320_v10  ;;  %v3010_v27 = vcombine.high %v1313_v36, %v1320_v10  ;;  %v1375_v28 = vcombine.low %v1247_v31, %v1254_v25  ;;  %v3009_v30 = vcombine.high %v1247_v31, %v1254_v25 }
 0x3a7   : > { %v1348_v46 = vrot.slane %v1341_v43, %v3555_v41  ;;  %v1366_v48 = vcombine.low %v1357_v44, %v1365_v45 }
 0x3a8   : > { %v1407_v33 = vrot.slane %v1400_v26, %v3547_v29  ;;  %v1415_v37 = vrot.slane %v3010_v27, %v3547_v29  ;;  %v1382_v38 = vrot.slane %v1375_v28, %v3547_v29  ;;  %v1390_v39 = vrot.slane %v3009_v30, %v3547_v29 }
 0x3a9   : > { %v1349_v50 = vcombine.high %v1348_v46, %v3398_v4  ;;  %v1373_v52 = vrot.slane %v1366_v48, %v3555_v41  ;;  %v1428_v56 = vshrl.u32 %v1348_v46, 16 }
 0x3aa   : > { %v1416_v42 = vcombine.low %v1407_v33, %v1415_v37  ;;  %v1391_v44 = vcombine.low %v1382_v38, %v1390_v39 }
 0x3ab   : > { %v1427_v54 = vpack.i.b16 %v1373_v52, %v1348_v46  ;;  %v1429_v57 = vshrl.u32 %v1373_v52, 16  ;;  %v1374_v58 = vcombine.high %v1373_v52, %v3398_v4  ;;  %v1434_v62 = vshrl.u32 %v1349_v50, 16 }
 0x3ac   : > { %v1423_v46 = vrot.slane %v1416_v42, %v3555_v41  ;;  %v1398_v47 = vrot.slane %v1391_v44, %v3555_v41 }
 0x3ad   : > { %v1939_v0 = vsel %vm1937_vm3, %v1427_v54, 0  ;;  %v1430_v2 = vpack.i.b16 %v1429_v57, %v1428_v56  ;;  %v1433_v3 = vpack.i.b16 %v1374_v58, %v1349_v50  ;;  %v1435_v5 = vshrl.u32 %v1374_v58, 16 }
 0x3ae   : > { %3176 = vmatpush3.bf16.msra.mxu0 %v1939_v0  ;;  %v1441_v51 = vshrl.u32 %v1423_v46, 16  ;;  %v1439_v53 = vpack.i.b16 %v1423_v46, %v1398_v47  ;;  %v1440_v54 = vshrl.u32 %v1398_v47, 16 }
 0x3af   : > { %v1985_v6 = vsel %vm1937_vm3, %v1430_v2, 0  ;;  %3187 = vmatprep.subr.bf16.mxu0 %v3402_v17  ;;  %v1436_v32 = vpack.i.b16 %v1435_v5, %v1434_v62  ;;  %v2031_v34 = vsel %vm1937_vm3, %v1433_v3, 0  ;;  %v1424_v62 = vcombine.high %v1423_v46, %v3398_v4 }
 0x3b0   : > { %3182 = vmatpush3.bf16.msra.mxu1 %v1985_v6  ;;  %v1442_v60 = vpack.i.b16 %v1441_v51, %v1440_v54  ;;  %v2123_v41 = vsel %vm1937_vm3, %v1439_v53, 0  ;;  %v3325_v51 = vld [vmem:[%s3472_s14 + $0x38] sm:$0xff]  }
 0x3b1   : > { %3178 = vmatmul.mubr.msk.bf16.vlgmr.msra.gmra.mrb[20].mxu0 %vm1837_vm2, %v1926_v7  ;;  %3193 = vmatprep.subr.bf16.mxu1 %v3402_v17  ;;  %v2077_v14 = vsel %vm1937_vm3, %v1436_v32, 0  ;;  %v1447_v6 = vshrl.u32 %v1424_v62, 16 }
 0x3b2   : > { %3188 = vmatpush3.bf16.msra.mxu0 %v2031_v34  ;;  %3189 = vmatprep.mubr.msk.bf16.mxu0 %vm3403_vm1, %v3402_v17  ;;  %v2169_v5 = vsel %vm1937_vm3, %v1442_v60, 0 }
 0x3b3   : > { %3184 = vmatmul.mubr.msk.bf16.vlgmr.msra.gmra.mrb[20].mxu1 %vm1837_vm2, %v1927_v9  ;;  %3199 = vmatprep.subr.bf16.mxu0 %v3402_v17 }
 0x3b4   : > { %3194 = vmatpush3.bf16.msra.mxu1 %v2077_v14  ;;  %3195 = vmatprep.mubr.msk.bf16.mxu1 %vm3403_vm1, %v3402_v17 }
 0x3b5   : > { %3205 = vmatprep.subr.bf16.mxu1 %v3402_v17 }
 0x3c6   : > { %v1894_v35 = vpop.xlane.xlu1 %1893 }
 0x3c7   : > { %3352 = vrcp.f32 %v1894_v35 }
 0x3c9   : > { %v1897_v40 = vpop.xlane.xlu0 %1896 }
 0x3ca   : > { %3354 = vrcp.f32 %v1897_v40  ;;  %v1903_v43 = vpop.xlane.xlu1 %1902  ;;  %v3323_v40 = vld [vmem:[%s3472_s14 + $0x30] sm:$0xff]  }
 0x3cb   : > { %3356 = vrcp.f32 %v1903_v43 }
 0x3cd   : > { %v1900_v45 = vpop.xlane.xlu0 %1899 }
 0x3ce   : > { %3358 = vrcp.f32 %v1900_v45  ;;  %v1909_v29 = vpop.xlane.xlu1 %1908 }
 0x3d1   : > { %v3353_v48 = vpop.eup %3352  ;;  %v1906_v50 = vpop.xlane.xlu0 %1905 }
 0x3d2   : > { %v1920_v52 = vmul.f32 %v3353_v48, %v3704_v49  ;;  %3360 = vrcp.f32 %v1906_v50  ;;  %v1399_v49 = vcombine.high %v1398_v47, %v3398_v4  ;;  %v3322_v47 = vld [vmem:[%s3472_s14 + $0x20] sm:$0xff]  }
 0x3d3   : > { %3362 = vrcp.f32 %v1909_v29  ;;  %v3324_v29 = vld [vmem:[%s3472_s14 + $0x28] sm:$0xff]  }
 0x3d4   : > { %v3355_v56 = vpop.eup %3354  ;;  %v1928_v57 = vpack.c.bf16 %v1920_v52, %v1920_v52  ;;  %v1445_v7 = vpack.i.b16 %v1424_v62, %v1399_v49  ;;  %v1446_v4 = vshrl.u32 %v1399_v49, 16 }
 0x3d5   : > { %v1921_v58 = vmul.f32 %v3355_v56, %v3706_v55  ;;  %v3357_v0 = vpop.eup %3356 }
 0x3d6   : > { %3190 = vmatmul.mubr.msk.bf16.vlgmr.msra.gmra.mrb[24].mxu0 %vm1837_vm2, %v1928_v57  ;;  %v1923_v32 = vmul.f32 %v3357_v0, %v3710_v59  ;;  %v1448_v9 = vpack.i.b16 %v1447_v6, %v1446_v4 }
 0x3d7   : > { %3200 = vmatpush3.bf16.msra.mxu0 %v2123_v41  ;;  %v1929_v2 = vpack.c.bf16 %v1921_v58, %v1921_v58  ;;  %3201 = vmatprep.mubr.msk.bf16.mxu0 %vm3403_vm1, %v3402_v17 }
 0x3d8   : > { %v3359_v3 = vpop.eup %3358  ;;  %3211 = vmatprep.subr.bf16.mxu0 %v3402_v17  ;;  %v1931_v11 = vpack.c.bf16 %v1923_v32, %v1923_v32  ;;  %v2261_v14 = vsel %vm1937_vm3, %v1448_v9, 0 }
 0x3d9   : > { %v1922_v55 = vmul.f32 %v3359_v3, %v3714_v61  ;;  %3196 = vmatmul.mubr.msk.bf16.vlgmr.msra.gmra.mrb[24].mxu1 %vm1837_vm2, %v1929_v2  ;;  %v2215_v61 = vsel %vm1937_vm3, %v1445_v7, 0 }
 0x3da   : > { %3206 = vmatpush3.bf16.msra.mxu1 %v2169_v5  ;;  %3207 = vmatprep.mubr.msk.bf16.mxu1 %vm3403_vm1, %v3402_v17 }
 0x3db   : > { %3217 = vmatprep.subr.bf16.mxu1 %v3402_v17  ;;  %v1930_v8 = vpack.c.bf16 %v1922_v55, %v1922_v55 }
 0x3dc   : > { %v3361_v34 = vpop.eup %3360 }
 0x3dd   : > { %v3363_v12 = vpop.eup %3362  ;;  %v1924_v59 = vmul.f32 %v3361_v34, %v3722_v1 }
 0x3de   : > { %3202 = vmatmul.mubr.msk.bf16.vlgmr.msra.gmra.mrb[28].mxu0 %vm1837_vm2, %v1930_v8  ;;  %v1925_v13 = vmul.f32 %v3363_v12, %v3718_v63  ;;  %v3320_v63 = vld [vmem:[%s3472_s14 + $0x8] sm:$0xff]  }
 0x3df   : > { %3212 = vmatpush3.bf16.msra.mxu0 %v2215_v61  ;;  %3213 = vmatprep.mubr.msk.bf16.mxu0 %vm3403_vm1, %v3402_v17  ;;  %v1932_v18 = vpack.c.bf16 %v1924_v59, %v1924_v59 }
 0x3e0   : > { %3223 = vmatprep.subr.bf16.mxu0 %v3402_v17  ;;  %v1933_v1 = vpack.c.bf16 %v1925_v13, %v1925_v13 }
 0x3e1   : > { %3208 = vmatmul.mubr.msk.bf16.vlgmr.msra.gmra.mrb[28].mxu1 %vm1837_vm2, %v1931_v11 }
 0x3e2   : > { %3218 = vmatpush3.bf16.msra.mxu1 %v2261_v14  ;;  %3219 = vmatprep.mubr.msk.bf16.mxu1 %vm3403_vm1, %v3402_v17 }
 0x3e3   : > { %3231 = vmatprep.subr.bf16.mxu1 %v3402_v17 }
 0x3e6   : > { %3214 = vmatmul.mubr.msk.bf16.vlgmr.msra.gmra.mrb[32].mxu0 %vm1837_vm2, %v1932_v18 }
 0x3e7   : > { %3227 = vmatprep.mubr.msk.bf16.mxu0 %vm3403_vm1, %v3402_v17  ;;  %3224 = vmatpush3.bf16.msra.mxu0 %v3319_v16 }
 0x3e8   : > { %3225 = vmatprep.subr.bf16.mxu0 %v3402_v17 }
 0x3e9   : > { %3220 = vmatmul.mubr.msk.bf16.vlgmr.msra.gmra.mrb[32].mxu1 %vm1837_vm2, %v1933_v1 }
 0x3ea   : > { %3235 = vmatprep.mubr.msk.bf16.mxu1 %vm3403_vm1, %v3402_v17  ;;  %3232 = vmatpush3.bf16.msra.mxu1 %v3318_v15 }
 0x3eb   : > { %3233 = vmatprep.subr.bf16.mxu1 %v3402_v17  ;;  %3226 = vmatpush3.bf16.msra.mxu0 %v3321_v19  ;;  %v3372_v19 = vld [vmem:[%s3915_s8] sm:$0xff] }
 0x3ec   : > { %3239 = vmatprep.subr.bf16.mxu0 %v3402_v17 }
 0x3ee   : > { %3234 = vmatpush3.bf16.msra.mxu1 %v3320_v63 }
 0x3ef   : > { %3247 = vmatprep.subr.bf16.mxu1 %v3402_v17 }
 0x484   : > { %v1975_v20 = vpop.f32.mrb[20].mxu0 }
 0x485   : > { %v3179_v21 = vpop.f32.mrb[21].mxu0 }
 0x486   : > { %v1978_v22 = vpop.f32.mrb[22].mxu0  ;;  %v2021_v23 = vpop.f32.mrb[20].mxu1 }
 0x487   : > { %v3180_v36 = vpop.f32.mrb[23].mxu0  ;;  %v3185_v10 = vpop.f32.mrb[21].mxu1  ;;  %v3373_v22 = vld [vmem:[%s3915_s8 + $0x8] sm:$0xff] }
 0x488   : > { %v2024_v31 = vpop.f32.mrb[22].mxu1 }
 0x489   : > { %v3186_v25 = vpop.f32.mrb[23].mxu1  ;;  %v3326_v31 = vld [vmem:[%s3482_s21] sm:$0xff]  }
 0x48a   : > { %v3327_v25 = vld [vmem:[%s3482_s21 + $0x8] sm:$0xff]  }
 0x4a9   : > { %v2067_v26 = vpop.f32.mrb[24].mxu0 }
 0x4aa   : > { %v3191_v27 = vpop.f32.mrb[25].mxu0 }
 0x4ab   : > { %v2070_v28 = vpop.f32.mrb[26].mxu0  ;;  %v3329_v27 = vld [vmem:[%s3487_s26 + $0x8] sm:$0xff]  }
 0x4ac   : > { %v2113_v30 = vpop.f32.mrb[24].mxu1  ;;  %v3192_v33 = vpop.f32.mrb[27].mxu0 }
 0x4ad   : > { %v3197_v37 = vpop.f32.mrb[25].mxu1 }
 0x4ae   : > { %v2116_v35 = vpop.f32.mrb[26].mxu1 }
 0x4af   : > { %v3198_v38 = vpop.f32.mrb[27].mxu1 }
 0x4b1   : > { %v2159_v39 = vpop.f32.mrb[28].mxu0 }
 0x4b2   : > { %v3061_v42 = vpack.c.bf16 %v2159_v39, %v1975_v20  ;;  %v3203_v43 = vpop.f32.mrb[29].mxu0 }
 0x4b3   : > { %v2162_v44 = vpop.f32.mrb[30].mxu0 }
 0x4b4   : > { %v2205_v45 = vpop.f32.mrb[28].mxu1  ;;  %v3204_v46 = vpop.f32.mrb[31].mxu0  ;;  %3236 = vmatmul.mubr.msk.bf16.vlgmr.msra.gmra.mrb[36].mxu1 %vm515_vm0, %v3061_v42 }
 0x4b5   : > { %v3060_v48 = vpack.c.bf16 %v2205_v45, %v2021_v23  ;;  %v3209_v50 = vpop.f32.mrb[29].mxu1  ;;  %3248 = vmatpush3.bf16.msra.mxu1 %v3323_v40  ;;  %3251 = vmatprep.mubr.msk.bf16.mxu1 %vm3403_vm1, %v3402_v17 }
 0x4b6   : > { %v2208_v52 = vpop.f32.mrb[30].mxu1  ;;  %3249 = vmatprep.subr.bf16.mxu1 %v3402_v17 }
 0x4b7   : > { %v3210_v53 = vpop.f32.mrb[31].mxu1  ;;  %3228 = vmatmul.mubr.msk.bf16.vlgmr.msra.gmra.mrb[36].mxu0 %vm515_vm0, %v3060_v48  ;;  %v3869_v52 = vld [vmem:[%s3492_s13] sm:$0xff] }
 0x4b8   : > { %3240 = vmatpush3.bf16.msra.mxu0 %v3322_v47  ;;  %3243 = vmatprep.mubr.msk.bf16.mxu0 %vm3403_vm1, %v3402_v17 }
 0x4b9   : > { %v2251_v54 = vpop.f32.mrb[32].mxu0  ;;  %3241 = vmatprep.subr.bf16.mxu0 %v3402_v17  ;;  %3250 = vmatpush3.bf16.msra.mxu1 %v3325_v51  ;;  %v2608_v51 = vsub.s32 2, %v3544_v24 }
 0x4ba   : > { %v3062_v56 = vpack.c.bf16 %v2251_v54, %v2067_v26  ;;  %v3215_v57 = vpop.f32.mrb[33].mxu0  ;;  %3263 = vmatprep.subr.bf16.mxu1 %v3402_v17  ;;  %v3328_v26 = vld [vmem:[%s3487_s26] sm:$0xff]   ;;  %v2614_v54 = vsub.s32 3, %v3544_v24 }
 0x4bb   : > { %v2254_v58 = vpop.f32.mrb[34].mxu0 }
 0x4bc   : > { %v2297_v60 = vpop.f32.mrb[32].mxu1  ;;  %3242 = vmatpush3.bf16.msra.mxu0 %v3324_v29  ;;  %v3216_v62 = vpop.f32.mrb[35].mxu0  ;;  %v2609_v29 = vrot.slane %v3869_v52, %v2608_v51 }
 0x4bd   : > { %v3063_v41 = vpack.c.bf16 %v2297_v60, %v2113_v30  ;;  %v3221_v0 = vpop.f32.mrb[33].mxu1  ;;  %3255 = vmatprep.subr.bf16.mxu0 %v3402_v17 }
 0x4be   : > { %v2300_v2 = vpop.f32.mrb[34].mxu1  ;;  %v2615_v0 = vrot.slane %v3869_v52, %v2614_v54 }
 0x4bf   : > { %v3222_v49 = vpop.f32.mrb[35].mxu1  ;;  %3244 = vmatmul.mubr.msk.bf16.vlgmr.msra.gmra.mrb[40].mxu0 %vm515_vm0, %v3062_v56  ;;  %3252 = vmatmul.mubr.msk.bf16.vlgmr.msra.gmra.mrb[40].mxu1 %vm515_vm0, %v3063_v41 }
 0x4c0   : > { %3259 = vmatprep.mubr.msk.bf16.mxu0 %vm3403_vm1, %v3402_v17  ;;  %3271 = vmatprep.mubr.msk.bf16.mxu1 %vm3403_vm1, %v3402_v17 }
 0x4c1   : > { %3256 = vmatpush3.bf16.msra.mxu0 %v3326_v31  ;;  %3264 = vmatpush3.bf16.msra.mxu1 %v3328_v26 }
 0x4c2   : > { %3257 = vmatprep.subr.bf16.mxu0 %v3402_v17  ;;  %3265 = vmatprep.subr.bf16.mxu1 %v3402_v17 }
 0x4c5   : > { %3258 = vmatpush3.bf16.msra.mxu0 %v3327_v25  ;;  %3266 = vmatpush3.bf16.msra.mxu1 %v3329_v27 }
 0x4c6   : > { %3267 = vmatprep.subr.bf16.mxu1 %v3402_v17 }
 0x587   : > { %v2442_v3 = vpop.f32.mrb[36].mxu1 }
 0x588   : > { %v3237_v55 = vpop.f32.mrb[37].mxu1 }
 0x589   : > { %v2445_v5 = vpop.f32.mrb[38].mxu1 }
 0x58a   : > { %v2381_v6 = vpop.f32.mrb[36].mxu0  ;;  %v3238_v7 = vpop.f32.mrb[39].mxu1 }
 0x58b   : > { %v2443_v32 = vadd.f32 %v2442_v3, %v2381_v6  ;;  %v3229_v4 = vpop.f32.mrb[37].mxu0  ;;  %v3331_v6 = vld [vmem:[%s3487_s26 + $0x18] sm:$0xff]   ;;  %v2625_v7 = vsub.s32 0, %v3544_v24 }
 0x58c   : > { %v2384_v8 = vpop.f32.mrb[38].mxu0 }
 0x58d   : > { %v2446_v34 = vadd.f32 %v2445_v5, %v2384_v8  ;;  %v3230_v9 = vpop.f32.mrb[39].mxu0  ;;  %v3330_v5 = vld [vmem:[%s3487_s26 + $0x10] sm:$0xff]  }
 0x58e   : > { %3268 = vmatpush3.bf16.msra.mxu1 %v3330_v5 }
 0x58f   : > { %3269 = vmatprep.subr.bf16.mxu1 %v3402_v17 }
 0x592   : > { %v2503_v61 = vpop.f32.mrb[40].mxu0  ;;  %v2566_v11 = vpop.f32.mrb[40].mxu1  ;;  %3270 = vmatpush3.bf16.msra.mxu1 %v3331_v6 }
 0x593   : > { %v2510_v12 = vadd.f32 %v2503_v61, %v2443_v32  ;;  %v3245_v59 = vpop.f32.mrb[41].mxu0  ;;  %v3253_v14 = vpop.f32.mrb[41].mxu1  ;;  %v2626_v32 = vrot.slane %v3869_v52, %v2625_v7 }
 0x594   : > { %v2506_v13 = vpop.f32.mrb[42].mxu0  ;;  %v2569_v18 = vpop.f32.mrb[42].mxu1 }
 0x595   : > { %v2573_v1 = vadd.f32 %v2566_v11, %v2510_v12  ;;  %v2511_v15 = vadd.f32 %v2506_v13, %v2446_v34  ;;  %v3246_v16 = vpop.f32.mrb[43].mxu0  ;;  %v3254_v63 = vpop.f32.mrb[43].mxu1  ;;  %v2696_v13 = vsub.s32 1, %v3544_v24 }
 0x597   : > { %v2576_v20 = vadd.f32 %v3372_v19, %v2573_v1  ;;  %v2574_v21 = vadd.f32 %v2569_v18, %v2511_v15  ;;  %v2697_v17 = vrot.slane %v3869_v52, %v2696_v13 }
 0x599   : > { %v2577_v23 = vadd.f32 %v3373_v22, %v2574_v21  ;;  %2578 = vadd.xlane.f32.xlu0 %v2576_v20  ;;  %v2584_v36 = vmul.f32 %v2576_v20, %v2576_v20 }
 0x59b   : > { %2580 = vadd.xlane.f32.xlu1 %v2577_v23  ;;  %v2585_v10 = vmul.f32 %v2577_v23, %v2577_v23 }
 0x59d   : > { %2586 = vadd.xlane.f32.xlu0 %v2584_v36  ;;  %v471_v36 = vld [vmem:[%s3909_s2 + $0x8] sm:$0xff] }
 0x59f   : > { %2588 = vadd.xlane.f32.xlu1 %v2585_v10  ;;  %v470_v10 = vld [vmem:[%s3909_s2] sm:$0xff] }
 0x626   : > { %v2579_v28 = vpop.xlane.xlu0 %2578 }
 0x627   : > { %v2582_v30 = vmul.f32 0.03125, %v2579_v28 }
 0x628   : > { %v2581_v33 = vpop.xlane.xlu1 %2580 }
 0x629   : > { %v2583_v37 = vmul.f32 0.03125, %v2581_v33  ;;  %v2592_v38 = vmul.f32 %v2582_v30, %v2582_v30  ;;  %v2598_v53 = vsub.f32 %v2576_v20, %v2582_v30 }
 0x62a   : > { %v2587_v35 = vpop.xlane.xlu0 %2586 }
 0x62b   : > { %v2590_v39 = vmul.f32 0.03125, %v2587_v35  ;;  %v2593_v42 = vmul.f32 %v2583_v37, %v2583_v37  ;;  %v2599_v57 = vsub.f32 %v2577_v23, %v2583_v37 }
 0x62c   : > { %v2589_v40 = vpop.xlane.xlu1 %2588 }
 0x62d   : > { %v2594_v43 = vsub.f32 %v2590_v39, %v2592_v38  ;;  %v2591_v44 = vmul.f32 0.03125, %v2589_v40 }
 0x62f   : > { %v2596_v45 = vmax.f32 %v2594_v43, 0.0  ;;  %v2595_v46 = vsub.f32 %v2591_v44, %v2593_v42 }
 0x631   : > { %v2600_v47 = vadd.f32 1e-05, %v2596_v45  ;;  %v2597_v48 = vmax.f32 %v2595_v46, 0.0  ;;  %v2799_v46 = vsub.s32 4, %v3544_v24 }
 0x633   : > { %3364 = vrsqrt.f32 %v2600_v47  ;;  %v2601_v50 = vadd.f32 1e-05, %v2597_v48  ;;  %v2805_v47 = vsub.s32 5, %v3544_v24 }
 0x635   : > { %3366 = vrsqrt.f32 %v2601_v50  ;;  %v2800_v50 = vrot.slane %v3869_v52, %v2799_v46  ;;  %v2806_v54 = vrot.slane %v3869_v52, %v2805_v47 }
 0x63d   : > { %v3365_v56 = vpop.eup %3364 }
 0x63e   : > { %v2604_v58 = vmul.f32 %v3365_v56, %v2598_v53 }
 0x63f   : > { %v3367_v60 = vpop.eup %3366 }
 0x640   : > { %v2605_v62 = vmul.f32 %v3367_v60, %v2599_v57  ;;  %v2610_v41 = vmul.f32 %v2609_v29, %v2604_v58 }
 0x642   : > { %v2611_v2 = vmul.f32 %v2609_v29, %v2605_v62  ;;  %v2616_v49 = vadd.f32 %v2615_v0, %v2610_v41 }
 0x644   : > { %v2617_v3 = vadd.f32 %v2615_v0, %v2611_v2 }
 0x646   : > { %v2618_v55 = vpack.c.bf16 %v2617_v3, %v2616_v49 }
 0x648   : > { %3260 = vmatmul.mubr.msk.bf16.vlgmr.msra.gmra.mrb[44].mxu0 %vm515_vm0, %v2618_v55 }
 0x71b   : > { %v2676_v4 = vpop.f32.mrb[44].mxu0 }
 0x71c   : > { %v2677_v8 = vadd.f32 %v2676_v4, %v2626_v32  ;;  %v3261_v34 = vpop.f32.mrb[45].mxu0 }
 0x71d   : > { %v2679_v9 = vpop.f32.mrb[46].mxu0 }
 0x71e   : > { %v2680_v61 = vadd.f32 %v2679_v9, %v2626_v32  ;;  %v3262_v11 = vpop.f32.mrb[47].mxu0  ;;  %v2683_v12 = vmax.f32 %v2677_v8, 0.0 }
 0x720   : > { %v2684_v59 = vmax.f32 %v2680_v61, 0.0 }
 0x722   : > { %v2685_v14 = vpack.c.bf16 %v2684_v59, %v2683_v12 }
 0x724   : > { %3272 = vmatmul.mubr.msk.bf16.vlgmr.msra.gmra.mrb[44].mxu1 %vm2722_vm4, %v2685_v14 }
 0x7f7   : > { %v2760_v18 = vpop.f32.mrb[44].mxu1 }
 0x7f8   : > { %v2761_v1 = vadd.f32 %v2760_v18, %v2697_v17  ;;  %v3273_v15 = vpop.f32.mrb[45].mxu1 }
 0x7f9   : > { %v2763_v16 = vpop.f32.mrb[46].mxu1 }
 0x7fa   : > { %v2767_v63 = vadd.f32 %v2761_v1, %v2616_v49  ;;  %v2764_v19 = vadd.f32 %v2763_v16, %v2697_v17  ;;  %v3274_v20 = vpop.f32.mrb[47].mxu1 }
 0x7fc   : > { %v2768_v21 = vadd.f32 %v2764_v19, %v2617_v3  ;;  %2769 = vadd.xlane.f32.xlu0 %v2767_v63  ;;  %v2775_v22 = vmul.f32 %v2767_v63, %v2767_v63 }
 0x7fe   : > { %2771 = vadd.xlane.f32.xlu1 %v2768_v21  ;;  %v2776_v23 = vmul.f32 %v2768_v21, %v2768_v21 }
 0x800   : > { %2777 = vadd.xlane.f32.xlu0 %v2775_v22 }
 0x802   : > { %2779 = vadd.xlane.f32.xlu1 %v2776_v23 }
 0x813   : > { %2816 = vperm.xlu1 %3309, %v471_v36  }
 0x816   : > { %2811 = vperm.xlu0 %3308, %v470_v10  }
 0x889   : > { %v2770_v31 = vpop.xlane.xlu0 %2769 }
 0x88a   : > { %v2773_v25 = vmul.f32 0.03125, %v2770_v31 }
 0x88b   : > { %v2772_v26 = vpop.xlane.xlu1 %2771 }
 0x88c   : > { %v2774_v27 = vmul.f32 0.03125, %v2772_v26  ;;  %v2783_v30 = vmul.f32 %v2773_v25, %v2773_v25  ;;  %v2789_v48 = vsub.f32 %v2767_v63, %v2773_v25 }
 0x88d   : > { %v2778_v28 = vpop.xlane.xlu0 %2777 }
 0x88e   : > { %v2781_v33 = vmul.f32 0.03125, %v2778_v28  ;;  %v2784_v35 = vmul.f32 %v2774_v27, %v2774_v27  ;;  %v2790_v53 = vsub.f32 %v2768_v21, %v2774_v27 }
 0x88f   : > { %v2780_v37 = vpop.xlane.xlu1 %2779 }
 0x890   : > { %v2785_v38 = vsub.f32 %v2781_v33, %v2783_v30  ;;  %v2782_v39 = vmul.f32 0.03125, %v2780_v37 }
 0x892   : > { %v2787_v40 = vmax.f32 %v2785_v38, 0.0  ;;  %v2786_v42 = vsub.f32 %v2782_v39, %v2784_v35 }
 0x893   : > { %v2817_v0 = vpop.permute.xlu1 %2816 }
 0x894   : > { %v2791_v43 = vadd.f32 1e-05, %v2787_v40  ;;  %v2788_v44 = vmax.f32 %v2786_v42, 0.0 }
 0x895   : > { %v2812_v60 = vpop.permute.xlu0 %2811 }
 0x896   : > { %3368 = vrsqrt.f32 %v2791_v43  ;;  %v2792_v45 = vadd.f32 1e-05, %v2788_v44 }
 0x898   : > { %3370 = vrsqrt.f32 %v2792_v45 }
 0x8a0   : > { %v3369_v51 = vpop.eup %3368 }
 0x8a1   : > { %v2795_v29 = vmul.f32 %v3369_v51, %v2789_v48 }
 0x8a2   : > { %v3371_v56 = vpop.eup %3370 }
 0x8a3   : > { %v2801_v57 = vmul.f32 %v2800_v50, %v2795_v29  ;;  %v2796_v58 = vmul.f32 %v3371_v56, %v2790_v53 }
 0x8a5   : > { %v2807_v62 = vadd.f32 %v2806_v54, %v2801_v57  ;;  %v2802_v41 = vmul.f32 %v2800_v50, %v2796_v58 }
 0x8a7   : > { %v2819_v2 = vmul.f32 %v2812_v60, %v2807_v62  ;;  %v2808_v49 = vadd.f32 %v2806_v54, %v2802_v41 }
 0x8a9   : > { %2821 = vst [vmem:[%s3915_s8] sm:$0xff] %v2819_v2  ;;  %v2820_v24 = vmul.f32 %v2817_v0, %v2808_v49 }
 0x8ab   : > { %2822 = vst [vmem:[%s3915_s8 + $0x8] sm:$0xff] %v2820_v24 }
 0x8ac PF: > { %s18_s29 = sadd.s32 1, %s3396_s29   ;;  %s3916_s27 = smov %s3392_s28 }
 0x8ad   : > { %p15_p6 = scmp.ge.s32.totalorder %s18_s29, 4   ;;  %s3917_s28 = smov %s3919_s30 }
 0x8af   :  { %17 = sbr.rel (!%p15_p6) target bundleno = 2 (0x2), region = 107 }

</bundles_post_ra>
